<compile_context>
chip_gen: v6e
topology: v6e:2x2x1
jax: 0.10.0
libtpu: 0.0.40
codegen_flags: <defaults>
</compile_context>

<pallas_src>
import functools

import numpy as np
import jax
import jax.numpy as jnp
from jax.experimental import pallas as pl
from jax.experimental.pallas import tpu as pltpu


# ----------------------------- Pallas kernel --------------------------------

def _dc_kernel(lam_ref, x_ref, y_ref, m_ref, fh_ref, fw_ref, o_ref, *,
               coils_per_step, H, use_bf16):
    """One (batch, coil-chunk) step: x - lam * F^H( mask * (F x - y) ).

    x_ref / y_ref / o_ref : (2, Ck*H, W)  re/im planes, Ck coils folded in rows
    m_ref                 : (1, H, W)     sampling mask (shared by all coils)
    fh_ref / fw_ref       : (2, H, H) / (2, W, W)  orthonormal DFT matrices
    lam_ref               : (1,) in SMEM
    """
    lam = lam_ref[0]
    m = m_ref[0]                      # (H, W) f32
    fhr, fhi = fh_ref[0], fh_ref[1]   # (H, H)
    fwr, fwi = fw_ref[0], fw_ref[1]   # (W, W)
    fhi_neg = -fhi                    # conj(Fh) imag part (hoisted)

    cdtype = jnp.bfloat16 if use_bf16 else jnp.float32
    # lam folded into conj(Fw): out = x - D @ (lam * conj(Fw)).  Scales a WxW
    # constant instead of two (Ck*H, W) planes in the store epilogue.
    fwc_r = (lam * fwr).astype(cdtype)
    fwc_i = (-lam * fwi).astype(cdtype)

    if use_bf16:
        def cmm(ar, ai, br, bi):
            # bf16 operands / f32 accumulation.  Plain 4-matmul complex form:
            # Gauss's t3-t1-t2 cancellation amplifies bf16 rounding, and the
            # +/- combine here can fold into MRB accumulation on v7x.
            ar = ar.astype(jnp.bfloat16); ai = ai.astype(jnp.bfloat16)
            br = br.astype(jnp.bfloat16); bi = bi.astype(jnp.bfloat16)
            re = (jnp.dot(ar, br, preferred_element_type=jnp.float32)
                  - jnp.dot(ai, bi, preferred_element_type=jnp.float32))
            im = (jnp.dot(ar, bi, preferred_element_type=jnp.float32)
                  + jnp.dot(ai, br, preferred_element_type=jnp.float32))
            return re, im
    else:
        def cmm(ar, ai, br, bi):
            # f32 operands: Gauss 3-multiplication (3 real MXU matmuls vs 4).
            t1 = jnp.dot(ar, br, preferred_element_type=jnp.float32)
            t2 = jnp.dot(ai, bi, preferred_element_type=jnp.float32)
            t3 = jnp.dot(ar + ai, br + bi, preferred_element_type=jnp.float32)
            return t1 - t2, t3 - t1 - t2

    # ---- W-direction DFT, the chunk's coils folded into the M dim:
    #      T = X @ Fw                               [(Ck*H, W) @ (W, W)]
    t_r, t_i = cmm(x_ref[0], x_ref[1], fwr, fwi)

    # ---- per-coil H-direction DFT, masked k-space residual, inverse
    # H-direction DFT.  coils_per_step is kept small by the VMEM-budgeted
    # chunk chooser, so this static loop stays short and the T slices stay
    # static.  D is parked in o_ref (reused as scratch; fully overwritten by
    # the final store below, before HBM write-back of this output block).
    for c in range(coils_per_step):
        rows = slice(c * H, (c + 1) * H)
        kr, ki = cmm(fhr, fhi, t_r[rows], t_i[rows])      # K_c = Fh @ T_c
        rr = m * (kr - y_ref[0, rows])                    # masked residual
        ri = m * (ki - y_ref[1, rows])
        dr, di = cmm(fhr, fhi_neg, rr, ri)                # D_c = conj(Fh) @ R_c
        o_ref[0, rows] = dr
        o_ref[1, rows] = di

    # ---- inverse W-direction DFT (lam pre-folded) and DC update
    g_r, g_i = cmm(o_ref[0], o_ref[1], fwc_r, fwc_i)
    o_ref[0] = x_ref[0] - g_r
    o_ref[1] = x_ref[1] - g_i


# --------------------------- pallas_call builder -----------------------------

def _vmem_capacity_bytes():
    """Per-core VMEM capacity; conservative v7x fallback if the query fails."""
    try:
        return int(pltpu.get_tpu_info().vmem_capacity_bytes)
    except Exception:
        return 64 * 2**20


def _choose_coil_chunk(n_batch, n_coils, H, W, budget_bytes):
    """Coils per grid step: per-step VMEM fits the budget, chunks divide C
    evenly, and the pipeline gets >= 4 (even, for v7x megacore) grid steps."""
    per_coil = (48 + 16) * H * W     # x/y/out double-buffered + live intermediates
    ck = int(max(1, min(n_coils, budget_bytes // per_coil)))
    while n_coils % ck:              # keep chunks uniform
        ck -= 1

    def steps(c):
        return n_batch * (n_coils // c)

    while ck > 1 and (steps(ck) < 4 or steps(ck) % 2):
        ck -= 1
        while n_coils % ck:
            ck -= 1
    return ck


def _dc_pallas(lam, xri, yri, m, fh, fw, *, n_batch, n_coils,
               single_buffer_consts=True):
    two, BH, W = xri.shape
    H = fh.shape[-1]
    assert two == 2 and BH == n_batch * n_coils * H
    B = n_batch * n_coils
    use_bf16 = (fh.dtype == jnp.bfloat16)
    esz = fh.dtype.itemsize                     # DFT-matrix element size

    vmem_cap = _vmem_capacity_bytes()
    ck = _choose_coil_chunk(n_batch, n_coils, H, W, int(0.6 * vmem_cap))
    n_chunks = n_coils // ck

    data_spec = pl.BlockSpec((2, ck * H, W),
                             lambda n, c: (0, n * n_chunks + c, 0))
    mask_spec = pl.BlockSpec((1, H, W), lambda n, c: (n, 0, 0))
    # constant blocks -> single buffer (their index_map never changes)
    const_kw = dict(pipeline_mode=pl.Buffered(1)) if single_buffer_consts else {}
    fh_spec = pl.BlockSpec((2, H, H), lambda n, c: (0, 0, 0), **const_kw)
    fw_spec = pl.BlockSpec((2, W, W), lambda n, c: (0, 0, 0), **const_kw)

    # advisory cost estimate: 4 complex matmuls per coil, 3 (Gauss/f32) or
    # 4 (bf16) real MXU matmuls each, plus the elementwise residual/update.
    real_mms = 4 if use_bf16 else 3
    flops = int(real_mms * 4 * B * H * W * (H + W) + 10 * B * H * W)
    bytes_accessed = int(4 * 3 * 2 * B * H * W        # x, y, out f32 planes
                         + 4 * n_batch * H * W        # un-replicated mask
                         + esz * 2 * (H * H + W * W)  # DFT matrices
                         + 4)                         # lam

    # itemised VMEM need for this block choice (review: no 2x hedge)
    tile = 4 * 2 * ck * H * W                         # one buffer of one data array
    const_bufs = 1 if single_buffer_consts else 2
    vmem_needed = (3 * 2 * tile                       # x, y, out double-buffered
                   + 2 * 4 * H * W                    # mask double-buffered
                   + const_bufs * esz * 2 * (H * H + W * W)   # fh, fw
                   + 2 * esz * W * W                  # lam-folded conj(Fw)
                   + 4 * tile + 8 * 4 * H * W)        # live T/G + per-coil temps
    vmem_limit = int(min(0.9 * vmem_cap,
                         max(16 * 2**20, 1.25 * vmem_needed)))

    return pl.pallas_call(
        functools.partial(_dc_kernel, coils_per_step=ck, H=H,
                          use_bf16=use_bf16),
        grid=(n_batch, n_chunks),
        in_specs=[
            pl.BlockSpec(memory_space=pltpu.MemorySpace.SMEM),   # lam scalar
            data_spec,            # x re/im planes
            data_spec,            # y re/im planes
            mask_spec,            # mask: per batch element, broadcast over coils
            fh_spec, fw_spec,     # constant DFT matrices (single-buffered)
        ],
        out_specs=data_spec,
        out_shape=jax.ShapeDtypeStruct((2, B * H, W), jnp.float32),
        compiler_params=pltpu.CompilerParams(
            dimension_semantics=("parallel", "parallel"),   # coils independent
            vmem_limit_bytes=vmem_limit),
        cost_estimate=pl.CostEstimate(flops=flops, transcendentals=0,
                                      bytes_accessed=bytes_accessed),
    )(lam, xri, yri, m, fh, fw)


# ------------------------------- glue (JAX) ----------------------------------

@functools.lru_cache(maxsize=None)
def _ortho_dft_matrix(n):
    """Stacked (2, n, n) [real, imag] orthonormal DFT matrix (numpy, cached)."""
    idx = np.arange(n)
    f = np.exp(-2j * np.pi * np.outer(idx, idx) / n) / np.sqrt(n)
    return np.stack([f.real, f.imag]).astype(np.float32)


def multicoil_gd_dc(x5, y, mask, lam, *, use_bf16=False,
                    single_buffer_consts=True):
    """Inner `model`: per-coil GD data-consistency layer.

    x5   : (N, C, 1, H, W, 2)  image with singleton smaps axis (from unsqueeze(2))
    y    : (N, C, H, W, 2)     measured multicoil k-space
    mask : (N, 1, *, W)        sampling mask, coil axis must be singleton
    lam  : (1,)                learnable DC weight
    """
    N, C, S, H, W, two = x5.shape
    assert S == 1 and two == 2
    if mask.ndim != 4 or mask.shape[0] != N or mask.shape[1] != 1:
        raise ValueError(
            f"mask must be (N, 1, H, W)-broadcastable with a singleton coil "
            f"axis; got {mask.shape}")   # reject per-coil masks explicitly

    # one fused relayout per array: (..., 2) -> (2, N*C*H, W) re/im planes
    xri = jnp.moveaxis(x5.reshape(N * C * H, W, 2), -1, 0)
    yri = jnp.moveaxis(y.reshape(N * C * H, W, 2), -1, 0)
    m = jnp.broadcast_to(mask, (N, 1, H, W)).reshape(N, H, W).astype(jnp.float32)

    fh = jnp.asarray(_ortho_dft_matrix(H))
    fw = jnp.asarray(_ortho_dft_matrix(W))
    if use_bf16:
        fh = fh.astype(jnp.bfloat16)
        fw = fw.astype(jnp.bfloat16)

    ori = _dc_pallas(lam, xri, yri, m, fh, fw, n_batch=N, n_coils=C,
                     single_buffer_consts=single_buffer_consts)
    return jnp.moveaxis(ori, 0, -1).reshape(N, C, 1, H, W, 2)


@functools.partial(jax.jit, static_argnames=("use_bf16", "single_buffer_consts"))
def _forward_impl(x, y, mask, lam, *, use_bf16, single_buffer_consts):
    x5 = jnp.expand_dims(x, 2)                       # x.unsqueeze(2)
    x_dc = multicoil_gd_dc(x5, y, mask, lam, use_bf16=use_bf16,
                           single_buffer_consts=single_buffer_consts)
    return jnp.squeeze(x_dc, 2)                      # x_dc.squeeze(2)


_SINGLE_BUFFER_CONSTS = True   # flipped off once if the runtime rejects Buffered(1)


def parallel_coil_dc_wrapper(x, y, mask, lam, *, use_bf16=False):
    """Forward of ParallelCoilDCWrapper: unsqueeze(2) -> model -> squeeze(2)."""
    global _SINGLE_BUFFER_CONSTS
    try:
        out = _forward_impl(x, y, mask, lam, use_bf16=use_bf16,
                            single_buffer_consts=_SINGLE_BUFFER_CONSTS)
        return jax.block_until_ready(out)
    except Exception:
        if not _SINGLE_BUFFER_CONSTS:
            raise
        # graceful fallback for Pallas builds without pipeline_mode=Buffered(1)
        _SINGLE_BUFFER_CONSTS = False
        out = _forward_impl(x, y, mask, lam, use_bf16=use_bf16,
                            single_buffer_consts=False)
        return jax.block_until_ready(out)


# --------------------------------- main ---------------------------------------

if __name__ == "__main__":
    N, C, H, W = 2, 4, 16, 16
    key = jax.random.PRNGKey(0)
    k1, k2, k3 = jax.random.split(key, 3)

    x = jax.random.normal(k1, (N, C, H, W, 2), dtype=jnp.float32)
    y = jax.random.normal(k2, (N, C, H, W, 2), dtype=jnp.float32)
    # Cartesian-style undersampling mask, broadcast over coils and rows
    mask_cols = (jax.random.uniform(k3, (N, 1, 1, W)) < 0.4).astype(jnp.float32)
    mask = jnp.broadcast_to(mask_cols, (N, 1, H, W))

    # deterministic "learnable" DC weight (DataGDLayer default init)
    lam = jnp.array([1.0], dtype=jnp.float32)

    out = parallel_coil_dc_wrapper(x, y, mask, lam)
    out = jax.block_until_ready(out)

    # pure-JAX reference (FFT based) for correctness
    xc = x[..., 0] + 1j * x[..., 1]
    yc = y[..., 0] + 1j * y[..., 1]
    kk = jnp.fft.fft2(xc, norm="ortho")
    grad = jnp.fft.ifft2(mask * (kk - yc), norm="ortho")
    ref_c = xc - lam[0] * grad
    ref = jnp.stack([ref_c.real, ref_c.imag], axis=-1)

    assert out.shape == (N, C, H, W, 2)
    np.testing.assert_allclose(np.asarray(out), np.asarray(ref),
                               rtol=1e-4, atol=1e-4)

    # bf16 MXU path: smoke test only.  At this size its error is ~1e-2
    # (fails the 1e-4 gate), so the default path above stays f32/Gauss.
    out_bf16 = parallel_coil_dc_wrapper(x, y, mask, lam, use_bf16=True)
    out_bf16 = jax.block_until_ready(out_bf16)
    np.testing.assert_allclose(np.asarray(out_bf16), np.asarray(ref),
                               rtol=0.05, atol=0.1)

    print("KERNEL_OK")
</pallas_src>

<mosaic_0001>
module attributes {stable_mosaic.version = 11 : i64} {
  func.func @_dc_kernel(%arg0: i32, %arg1: i32, %arg2: memref<1xf32, #tpu.memory_space<smem>>, %arg3: memref<2x32x16xf32, #tpu.memory_space<vmem>>, %arg4: memref<2x32x16xf32, #tpu.memory_space<vmem>>, %arg5: memref<1x16x16xf32, #tpu.memory_space<vmem>>, %arg6: memref<2x16x16xf32, #tpu.memory_space<vmem>>, %arg7: memref<2x16x16xf32, #tpu.memory_space<vmem>>, %arg8: memref<2x32x16xf32, #tpu.memory_space<vmem>>) attributes {dimension_semantics = [#tpu.dimension_semantics<parallel>, #tpu.dimension_semantics<parallel>], iteration_bounds = array<i64: 2, 2>, scalar_prefetch = 0 : i64, scratch_operands = 0 : i64, tpu.core_type = #tpu.core_type<tc>, window_params = [{transform_indices = @transform_0, window_bounds = array<i64: 1>}, {transform_indices = @transform_1, window_bounds = array<i64: 2, 32, 16>}, {transform_indices = @transform_2, window_bounds = array<i64: 2, 32, 16>}, {transform_indices = @transform_3, window_bounds = array<i64: 1, 16, 16>}, {pipeline_mode = #tpu.pipeline_mode<synchronous>, transform_indices = @transform_4, window_bounds = array<i64: 2, 16, 16>}, {pipeline_mode = #tpu.pipeline_mode<synchronous>, transform_indices = @transform_5, window_bounds = array<i64: 2, 16, 16>}, {transform_indices = @transform_6, window_bounds = array<i64: 2, 32, 16>}]} {
    %c0 = arith.constant 0 : index
    %0 = memref.load %arg2[%c0] : memref<1xf32, #tpu.memory_space<smem>>
    %c0_0 = arith.constant 0 : index
    %c0_1 = arith.constant 0 : index
    %c0_2 = arith.constant 0 : index
    %1 = vector.load %arg5[%c0_0, %c0_1, %c0_2] : memref<1x16x16xf32, #tpu.memory_space<vmem>>, vector<1x16x16xf32>
    %2 = vector.shape_cast %1 : vector<1x16x16xf32> to vector<16x16xf32>
    %c0_3 = arith.constant 0 : index
    %c0_4 = arith.constant 0 : index
    %c0_5 = arith.constant 0 : index
    %3 = vector.load %arg6[%c0_3, %c0_4, %c0_5] : memref<2x16x16xf32, #tpu.memory_space<vmem>>, vector<1x16x16xf32>
    %4 = vector.shape_cast %3 : vector<1x16x16xf32> to vector<16x16xf32>
    %c1 = arith.constant 1 : index
    %c0_6 = arith.constant 0 : index
    %c0_7 = arith.constant 0 : index
    %5 = vector.load %arg6[%c1, %c0_6, %c0_7] : memref<2x16x16xf32, #tpu.memory_space<vmem>>, vector<1x16x16xf32>
    %6 = vector.shape_cast %5 : vector<1x16x16xf32> to vector<16x16xf32>
    %c0_8 = arith.constant 0 : index
    %c0_9 = arith.constant 0 : index
    %c0_10 = arith.constant 0 : index
    %7 = vector.load %arg7[%c0_8, %c0_9, %c0_10] : memref<2x16x16xf32, #tpu.memory_space<vmem>>, vector<1x16x16xf32>
    %8 = vector.shape_cast %7 : vector<1x16x16xf32> to vector<16x16xf32>
    %c1_11 = arith.constant 1 : index
    %c0_12 = arith.constant 0 : index
    %c0_13 = arith.constant 0 : index
    %9 = vector.load %arg7[%c1_11, %c0_12, %c0_13] : memref<2x16x16xf32, #tpu.memory_space<vmem>>, vector<1x16x16xf32>
    %10 = vector.shape_cast %9 : vector<1x16x16xf32> to vector<16x16xf32>
    %cst = arith.constant 0.000000e+00 : f32
    %11 = vector.broadcast %cst : f32 to vector<16x16xf32>
    %12 = arith.subf %11, %6 : vector<16x16xf32>
    %13 = vector.broadcast %0 : f32 to vector<16x16xf32>
    %14 = arith.mulf %13, %8 : vector<16x16xf32>
    %cst_14 = arith.constant 0.000000e+00 : f32
    %15 = arith.subf %cst_14, %0 : f32
    %16 = vector.broadcast %15 : f32 to vector<16x16xf32>
    %17 = arith.mulf %16, %10 : vector<16x16xf32>
    %c0_15 = arith.constant 0 : index
    %c0_16 = arith.constant 0 : index
    %c0_17 = arith.constant 0 : index
    %18 = vector.load %arg3[%c0_15, %c0_16, %c0_17] : memref<2x32x16xf32, #tpu.memory_space<vmem>>, vector<1x32x16xf32>
    %19 = vector.shape_cast %18 : vector<1x32x16xf32> to vector<32x16xf32>
    %c1_18 = arith.constant 1 : index
    %c0_19 = arith.constant 0 : index
    %c0_20 = arith.constant 0 : index
    %20 = vector.load %arg3[%c1_18, %c0_19, %c0_20] : memref<2x32x16xf32, #tpu.memory_space<vmem>>, vector<1x32x16xf32>
    %21 = vector.shape_cast %20 : vector<1x32x16xf32> to vector<32x16xf32>
    %cst_21 = arith.constant dense<0.000000e+00> : vector<32x16xf32>
    %22 = tpu.matmul %19, %8, %cst_21 {dimension_numbers = #tpu.dot_dimension_numbers<[1], [0], [0], [1], [0, 0, 1, 1], [], []>} : vector<32x16xf32>, vector<16x16xf32>, vector<32x16xf32> -> vector<32x16xf32>
    %cst_22 = arith.constant dense<0.000000e+00> : vector<32x16xf32>
    %23 = tpu.matmul %21, %10, %cst_22 {dimension_numbers = #tpu.dot_dimension_numbers<[1], [0], [0], [1], [0, 0, 1, 1], [], []>} : vector<32x16xf32>, vector<16x16xf32>, vector<32x16xf32> -> vector<32x16xf32>
    %24 = arith.addf %19, %21 : vector<32x16xf32>
    %25 = arith.addf %8, %10 : vector<16x16xf32>
    %cst_23 = arith.constant dense<0.000000e+00> : vector<32x16xf32>
    %26 = tpu.matmul %24, %25, %cst_23 {dimension_numbers = #tpu.dot_dimension_numbers<[1], [0], [0], [1], [0, 0, 1, 1], [], []>} : vector<32x16xf32>, vector<16x16xf32>, vector<32x16xf32> -> vector<32x16xf32>
    %27 = arith.subf %22, %23 : vector<32x16xf32>
    %28 = arith.subf %26, %22 : vector<32x16xf32>
    %29 = arith.subf %28, %23 : vector<32x16xf32>
    %30 = vector.extract_strided_slice %27 {offsets = [0, 0], sizes = [16, 16], strides = [1, 1]} : vector<32x16xf32> to vector<16x16xf32>
    %31 = vector.extract_strided_slice %29 {offsets = [0, 0], sizes = [16, 16], strides = [1, 1]} : vector<32x16xf32> to vector<16x16xf32>
    %cst_24 = arith.constant dense<0.000000e+00> : vector<16x16xf32>
    %32 = tpu.matmul %4, %30, %cst_24 {dimension_numbers = #tpu.dot_dimension_numbers<[1], [0], [0], [1], [0, 0, 1, 1], [], []>} : vector<16x16xf32>, vector<16x16xf32>, vector<16x16xf32> -> vector<16x16xf32>
    %cst_25 = arith.constant dense<0.000000e+00> : vector<16x16xf32>
    %33 = tpu.matmul %6, %31, %cst_25 {dimension_numbers = #tpu.dot_dimension_numbers<[1], [0], [0], [1], [0, 0, 1, 1], [], []>} : vector<16x16xf32>, vector<16x16xf32>, vector<16x16xf32> -> vector<16x16xf32>
    %34 = arith.addf %4, %6 : vector<16x16xf32>
    %35 = arith.addf %30, %31 : vector<16x16xf32>
    %cst_26 = arith.constant dense<0.000000e+00> : vector<16x16xf32>
    %36 = tpu.matmul %34, %35, %cst_26 {dimension_numbers = #tpu.dot_dimension_numbers<[1], [0], [0], [1], [0, 0, 1, 1], [], []>} : vector<16x16xf32>, vector<16x16xf32>, vector<16x16xf32> -> vector<16x16xf32>
    %37 = arith.subf %32, %33 : vector<16x16xf32>
    %38 = arith.subf %36, %32 : vector<16x16xf32>
    %39 = arith.subf %38, %33 : vector<16x16xf32>
    %c0_27 = arith.constant 0 : index
    %c0_28 = arith.constant 0 : index
    %c0_29 = arith.constant 0 : index
    %40 = vector.load %arg4[%c0_27, %c0_28, %c0_29] : memref<2x32x16xf32, #tpu.memory_space<vmem>>, vector<1x16x16xf32>
    %41 = vector.shape_cast %40 : vector<1x16x16xf32> to vector<16x16xf32>
    %42 = arith.subf %37, %41 : vector<16x16xf32>
    %43 = arith.mulf %2, %42 : vector<16x16xf32>
    %c1_30 = arith.constant 1 : index
    %c0_31 = arith.constant 0 : index
    %c0_32 = arith.constant 0 : index
    %44 = vector.load %arg4[%c1_30, %c0_31, %c0_32] : memref<2x32x16xf32, #tpu.memory_space<vmem>>, vector<1x16x16xf32>
    %45 = vector.shape_cast %44 : vector<1x16x16xf32> to vector<16x16xf32>
    %46 = arith.subf %39, %45 : vector<16x16xf32>
    %47 = arith.mulf %2, %46 : vector<16x16xf32>
    %cst_33 = arith.constant dense<0.000000e+00> : vector<16x16xf32>
    %48 = tpu.matmul %4, %43, %cst_33 {dimension_numbers = #tpu.dot_dimension_numbers<[1], [0], [0], [1], [0, 0, 1, 1], [], []>} : vector<16x16xf32>, vector<16x16xf32>, vector<16x16xf32> -> vector<16x16xf32>
    %cst_34 = arith.constant dense<0.000000e+00> : vector<16x16xf32>
    %49 = tpu.matmul %12, %47, %cst_34 {dimension_numbers = #tpu.dot_dimension_numbers<[1], [0], [0], [1], [0, 0, 1, 1], [], []>} : vector<16x16xf32>, vector<16x16xf32>, vector<16x16xf32> -> vector<16x16xf32>
    %50 = arith.addf %4, %12 : vector<16x16xf32>
    %51 = arith.addf %43, %47 : vector<16x16xf32>
    %cst_35 = arith.constant dense<0.000000e+00> : vector<16x16xf32>
    %52 = tpu.matmul %50, %51, %cst_35 {dimension_numbers = #tpu.dot_dimension_numbers<[1], [0], [0], [1], [0, 0, 1, 1], [], []>} : vector<16x16xf32>, vector<16x16xf32>, vector<16x16xf32> -> vector<16x16xf32>
    %53 = arith.subf %48, %49 : vector<16x16xf32>
    %54 = arith.subf %52, %48 : vector<16x16xf32>
    %55 = arith.subf %54, %49 : vector<16x16xf32>
    %c0_36 = arith.constant 0 : index
    %c0_37 = arith.constant 0 : index
    %c0_38 = arith.constant 0 : index
    %56 = vector.load %arg8[%c0_36, %c0_37, %c0_38] : memref<2x32x16xf32, #tpu.memory_space<vmem>>, vector<1x16x16xf32>
    %57 = vector.shape_cast %56 : vector<1x16x16xf32> to vector<16x16xf32>
    %58 = vector.shape_cast %53 : vector<16x16xf32> to vector<1x16x16xf32>
    tpu.vector_store %arg8[%c0_36, %c0_37, %c0_38], %58 {strides = array<i32>} : memref<2x32x16xf32, #tpu.memory_space<vmem>>, vector<1x16x16xf32>,
    %c1_39 = arith.constant 1 : index
    %c0_40 = arith.constant 0 : index
    %c0_41 = arith.constant 0 : index
    %59 = vector.load %arg8[%c1_39, %c0_40, %c0_41] : memref<2x32x16xf32, #tpu.memory_space<vmem>>, vector<1x16x16xf32>
    %60 = vector.shape_cast %59 : vector<1x16x16xf32> to vector<16x16xf32>
    %61 = vector.shape_cast %55 : vector<16x16xf32> to vector<1x16x16xf32>
    tpu.vector_store %arg8[%c1_39, %c0_40, %c0_41], %61 {strides = array<i32>} : memref<2x32x16xf32, #tpu.memory_space<vmem>>, vector<1x16x16xf32>,
    %62 = vector.extract_strided_slice %27 {offsets = [16, 0], sizes = [16, 16], strides = [1, 1]} : vector<32x16xf32> to vector<16x16xf32>
    %63 = vector.extract_strided_slice %29 {offsets = [16, 0], sizes = [16, 16], strides = [1, 1]} : vector<32x16xf32> to vector<16x16xf32>
    %cst_42 = arith.constant dense<0.000000e+00> : vector<16x16xf32>
    %64 = tpu.matmul %4, %62, %cst_42 {dimension_numbers = #tpu.dot_dimension_numbers<[1], [0], [0], [1], [0, 0, 1, 1], [], []>} : vector<16x16xf32>, vector<16x16xf32>, vector<16x16xf32> -> vector<16x16xf32>
    %cst_43 = arith.constant dense<0.000000e+00> : vector<16x16xf32>
    %65 = tpu.matmul %6, %63, %cst_43 {dimension_numbers = #tpu.dot_dimension_numbers<[1], [0], [0], [1], [0, 0, 1, 1], [], []>} : vector<16x16xf32>, vector<16x16xf32>, vector<16x16xf32> -> vector<16x16xf32>
    %66 = arith.addf %4, %6 : vector<16x16xf32>
    %67 = arith.addf %62, %63 : vector<16x16xf32>
    %cst_44 = arith.constant dense<0.000000e+00> : vector<16x16xf32>
    %68 = tpu.matmul %66, %67, %cst_44 {dimension_numbers = #tpu.dot_dimension_numbers<[1], [0], [0], [1], [0, 0, 1, 1], [], []>} : vector<16x16xf32>, vector<16x16xf32>, vector<16x16xf32> -> vector<16x16xf32>
    %69 = arith.subf %64, %65 : vector<16x16xf32>
    %70 = arith.subf %68, %64 : vector<16x16xf32>
    %71 = arith.subf %70, %65 : vector<16x16xf32>
    %c0_45 = arith.constant 0 : index
    %c16 = arith.constant 16 : index
    %c0_46 = arith.constant 0 : index
    %72 = vector.load %arg4[%c0_45, %c16, %c0_46] : memref<2x32x16xf32, #tpu.memory_space<vmem>>, vector<1x16x16xf32>
    %73 = vector.shape_cast %72 : vector<1x16x16xf32> to vector<16x16xf32>
    %74 = arith.subf %69, %73 : vector<16x16xf32>
    %75 = arith.mulf %2, %74 : vector<16x16xf32>
    %c1_47 = arith.constant 1 : index
    %c16_48 = arith.constant 16 : index
    %c0_49 = arith.constant 0 : index
    %76 = vector.load %arg4[%c1_47, %c16_48, %c0_49] : memref<2x32x16xf32, #tpu.memory_space<vmem>>, vector<1x16x16xf32>
    %77 = vector.shape_cast %76 : vector<1x16x16xf32> to vector<16x16xf32>
    %78 = arith.subf %71, %77 : vector<16x16xf32>
    %79 = arith.mulf %2, %78 : vector<16x16xf32>
    %cst_50 = arith.constant dense<0.000000e+00> : vector<16x16xf32>
    %80 = tpu.matmul %4, %75, %cst_50 {dimension_numbers = #tpu.dot_dimension_numbers<[1], [0], [0], [1], [0, 0, 1, 1], [], []>} : vector<16x16xf32>, vector<16x16xf32>, vector<16x16xf32> -> vector<16x16xf32>
    %cst_51 = arith.constant dense<0.000000e+00> : vector<16x16xf32>
    %81 = tpu.matmul %12, %79, %cst_51 {dimension_numbers = #tpu.dot_dimension_numbers<[1], [0], [0], [1], [0, 0, 1, 1], [], []>} : vector<16x16xf32>, vector<16x16xf32>, vector<16x16xf32> -> vector<16x16xf32>
    %82 = arith.addf %4, %12 : vector<16x16xf32>
    %83 = arith.addf %75, %79 : vector<16x16xf32>
    %cst_52 = arith.constant dense<0.000000e+00> : vector<16x16xf32>
    %84 = tpu.matmul %82, %83, %cst_52 {dimension_numbers = #tpu.dot_dimension_numbers<[1], [0], [0], [1], [0, 0, 1, 1], [], []>} : vector<16x16xf32>, vector<16x16xf32>, vector<16x16xf32> -> vector<16x16xf32>
    %85 = arith.subf %80, %81 : vector<16x16xf32>
    %86 = arith.subf %84, %80 : vector<16x16xf32>
    %87 = arith.subf %86, %81 : vector<16x16xf32>
    %c0_53 = arith.constant 0 : index
    %c16_54 = arith.constant 16 : index
    %c0_55 = arith.constant 0 : index
    %88 = vector.load %arg8[%c0_53, %c16_54, %c0_55] : memref<2x32x16xf32, #tpu.memory_space<vmem>>, vector<1x16x16xf32>
    %89 = vector.shape_cast %88 : vector<1x16x16xf32> to vector<16x16xf32>
    %90 = vector.shape_cast %85 : vector<16x16xf32> to vector<1x16x16xf32>
    tpu.vector_store %arg8[%c0_53, %c16_54, %c0_55], %90 {strides = array<i32>} : memref<2x32x16xf32, #tpu.memory_space<vmem>>, vector<1x16x16xf32>,
    %c1_56 = arith.constant 1 : index
    %c16_57 = arith.constant 16 : index
    %c0_58 = arith.constant 0 : index
    %91 = vector.load %arg8[%c1_56, %c16_57, %c0_58] : memref<2x32x16xf32, #tpu.memory_space<vmem>>, vector<1x16x16xf32>
    %92 = vector.shape_cast %91 : vector<1x16x16xf32> to vector<16x16xf32>
    %93 = vector.shape_cast %87 : vector<16x16xf32> to vector<1x16x16xf32>
    tpu.vector_store %arg8[%c1_56, %c16_57, %c0_58], %93 {strides = array<i32>} : memref<2x32x16xf32, #tpu.memory_space<vmem>>, vector<1x16x16xf32>,
    %c0_59 = arith.constant 0 : index
    %c0_60 = arith.constant 0 : index
    %c0_61 = arith.constant 0 : index
    %94 = vector.load %arg8[%c0_59, %c0_60, %c0_61] : memref<2x32x16xf32, #tpu.memory_space<vmem>>, vector<1x32x16xf32>
    %95 = vector.shape_cast %94 : vector<1x32x16xf32> to vector<32x16xf32>
    %c1_62 = arith.constant 1 : index
    %c0_63 = arith.constant 0 : index
    %c0_64 = arith.constant 0 : index
    %96 = vector.load %arg8[%c1_62, %c0_63, %c0_64] : memref<2x32x16xf32, #tpu.memory_space<vmem>>, vector<1x32x16xf32>
    %97 = vector.shape_cast %96 : vector<1x32x16xf32> to vector<32x16xf32>
    %cst_65 = arith.constant dense<0.000000e+00> : vector<32x16xf32>
    %98 = tpu.matmul %95, %14, %cst_65 {dimension_numbers = #tpu.dot_dimension_numbers<[1], [0], [0], [1], [0, 0, 1, 1], [], []>} : vector<32x16xf32>, vector<16x16xf32>, vector<32x16xf32> -> vector<32x16xf32>
    %cst_66 = arith.constant dense<0.000000e+00> : vector<32x16xf32>
    %99 = tpu.matmul %97, %17, %cst_66 {dimension_numbers = #tpu.dot_dimension_numbers<[1], [0], [0], [1], [0, 0, 1, 1], [], []>} : vector<32x16xf32>, vector<16x16xf32>, vector<32x16xf32> -> vector<32x16xf32>
    %100 = arith.addf %95, %97 : vector<32x16xf32>
    %101 = arith.addf %14, %17 : vector<16x16xf32>
    %cst_67 = arith.constant dense<0.000000e+00> : vector<32x16xf32>
    %102 = tpu.matmul %100, %101, %cst_67 {dimension_numbers = #tpu.dot_dimension_numbers<[1], [0], [0], [1], [0, 0, 1, 1], [], []>} : vector<32x16xf32>, vector<16x16xf32>, vector<32x16xf32> -> vector<32x16xf32>
    %103 = arith.subf %98, %99 : vector<32x16xf32>
    %104 = arith.subf %102, %98 : vector<32x16xf32>
    %105 = arith.subf %104, %99 : vector<32x16xf32>
    %c0_68 = arith.constant 0 : index
    %c0_69 = arith.constant 0 : index
    %c0_70 = arith.constant 0 : index
    %106 = vector.load %arg3[%c0_68, %c0_69, %c0_70] : memref<2x32x16xf32, #tpu.memory_space<vmem>>, vector<1x32x16xf32>
    %107 = vector.shape_cast %106 : vector<1x32x16xf32> to vector<32x16xf32>
    %108 = arith.subf %107, %103 : vector<32x16xf32>
    %c0_71 = arith.constant 0 : index
    %c0_72 = arith.constant 0 : index
    %c0_73 = arith.constant 0 : index
    %109 = vector.load %arg8[%c0_71, %c0_72, %c0_73] : memref<2x32x16xf32, #tpu.memory_space<vmem>>, vector<1x32x16xf32>
    %110 = vector.shape_cast %109 : vector<1x32x16xf32> to vector<32x16xf32>
    %111 = vector.shape_cast %108 : vector<32x16xf32> to vector<1x32x16xf32>
    tpu.vector_store %arg8[%c0_71, %c0_72, %c0_73], %111 {strides = array<i32>} : memref<2x32x16xf32, #tpu.memory_space<vmem>>, vector<1x32x16xf32>,
    %c1_74 = arith.constant 1 : index
    %c0_75 = arith.constant 0 : index
    %c0_76 = arith.constant 0 : index
    %112 = vector.load %arg3[%c1_74, %c0_75, %c0_76] : memref<2x32x16xf32, #tpu.memory_space<vmem>>, vector<1x32x16xf32>
    %113 = vector.shape_cast %112 : vector<1x32x16xf32> to vector<32x16xf32>
    %114 = arith.subf %113, %105 : vector<32x16xf32>
    %c1_77 = arith.constant 1 : index
    %c0_78 = arith.constant 0 : index
    %c0_79 = arith.constant 0 : index
    %115 = vector.load %arg8[%c1_77, %c0_78, %c0_79] : memref<2x32x16xf32, #tpu.memory_space<vmem>>, vector<1x32x16xf32>
    %116 = vector.shape_cast %115 : vector<1x32x16xf32> to vector<32x16xf32>
    %117 = vector.shape_cast %114 : vector<32x16xf32> to vector<1x32x16xf32>
    tpu.vector_store %arg8[%c1_77, %c0_78, %c0_79], %117 {strides = array<i32>} : memref<2x32x16xf32, #tpu.memory_space<vmem>>, vector<1x32x16xf32>,
    return
  }
  func.func @transform_0(%arg0: i32, %arg1: i32) -> i32 {
    %c0_i32 = arith.constant 0 : i32
    %c0_i32_0 = arith.constant 0 : i32
    return %c0_i32 : i32
  }
  func.func @transform_1(%arg0: i32, %arg1: i32) -> (i32, i32, i32) {
    %c2_i32 = arith.constant 2 : i32
    %0 = arith.muli %arg0, %c2_i32 : i32
    %1 = arith.addi %0, %arg1 : i32
    %c0_i32 = arith.constant 0 : i32
    %c0_i32_0 = arith.constant 0 : i32
    %c0_i32_1 = arith.constant 0 : i32
    return %c0_i32, %1, %c0_i32_0 : i32, i32, i32
  }
  func.func @transform_2(%arg0: i32, %arg1: i32) -> (i32, i32, i32) {
    %c2_i32 = arith.constant 2 : i32
    %0 = arith.muli %arg0, %c2_i32 : i32
    %1 = arith.addi %0, %arg1 : i32
    %c0_i32 = arith.constant 0 : i32
    %c0_i32_0 = arith.constant 0 : i32
    %c0_i32_1 = arith.constant 0 : i32
    return %c0_i32, %1, %c0_i32_0 : i32, i32, i32
  }
  func.func @transform_3(%arg0: i32, %arg1: i32) -> (i32, i32, i32) {
    %c0_i32 = arith.constant 0 : i32
    %c0_i32_0 = arith.constant 0 : i32
    %c0_i32_1 = arith.constant 0 : i32
    return %arg0, %c0_i32, %c0_i32_0 : i32, i32, i32
  }
  func.func @transform_4(%arg0: i32, %arg1: i32) -> (i32, i32, i32) {
    %c0_i32 = arith.constant 0 : i32
    %c0_i32_0 = arith.constant 0 : i32
    %c0_i32_1 = arith.constant 0 : i32
    %c0_i32_2 = arith.constant 0 : i32
    return %c0_i32, %c0_i32_0, %c0_i32_1 : i32, i32, i32
  }
  func.func @transform_5(%arg0: i32, %arg1: i32) -> (i32, i32, i32) {
    %c0_i32 = arith.constant 0 : i32
    %c0_i32_0 = arith.constant 0 : i32
    %c0_i32_1 = arith.constant 0 : i32
    %c0_i32_2 = arith.constant 0 : i32
    return %c0_i32, %c0_i32_0, %c0_i32_1 : i32, i32, i32
  }
  func.func @transform_6(%arg0: i32, %arg1: i32) -> (i32, i32, i32) {
    %c2_i32 = arith.constant 2 : i32
    %0 = arith.muli %arg0, %c2_i32 : i32
    %1 = arith.addi %0, %arg1 : i32
    %c0_i32 = arith.constant 0 : i32
    %c0_i32_0 = arith.constant 0 : i32
    %c0_i32_1 = arith.constant 0 : i32
    return %c0_i32, %1, %c0_i32_0 : i32, i32, i32
  }
}

module attributes {stable_mosaic.version = 11 : i64} {
  func.func @_dc_kernel(%arg0: i32, %arg1: i32, %arg2: memref<1xf32, #tpu.memory_space<smem>>, %arg3: memref<2x32x16xf32, #tpu.memory_space<vmem>>, %arg4: memref<2x32x16xf32, #tpu.memory_space<vmem>>, %arg5: memref<1x16x16xf32, #tpu.memory_space<vmem>>, %arg6: memref<2x16x16xf32, #tpu.memory_space<vmem>>, %arg7: memref<2x16x16xf32, #tpu.memory_space<vmem>>, %arg8: memref<2x32x16xf32, #tpu.memory_space<vmem>>) attributes {dimension_semantics = [#tpu.dimension_semantics<parallel>, #tpu.dimension_semantics<parallel>], iteration_bounds = array<i64: 2, 2>, scalar_prefetch = 0 : i64, scratch_operands = 0 : i64, tpu.core_type = #tpu.core_type<tc>, window_params = [{transform_indices = @transform_0, window_bounds = array<i64: 1>}, {transform_indices = @transform_1, window_bounds = array<i64: 2, 32, 16>}, {transform_indices = @transform_2, window_bounds = array<i64: 2, 32, 16>}, {transform_indices = @transform_3, window_bounds = array<i64: 1, 16, 16>}, {pipeline_mode = #tpu.pipeline_mode<synchronous>, transform_indices = @transform_4, window_bounds = array<i64: 2, 16, 16>}, {pipeline_mode = #tpu.pipeline_mode<synchronous>, transform_indices = @transform_5, window_bounds = array<i64: 2, 16, 16>}, {transform_indices = @transform_6, window_bounds = array<i64: 2, 32, 16>}]} {
    %c0 = arith.constant 0 : index
    %0 = memref.load %arg2[%c0] : memref<1xf32, #tpu.memory_space<smem>>
    %c0_0 = arith.constant 0 : index
    %c0_1 = arith.constant 0 : index
    %c0_2 = arith.constant 0 : index
    %1 = vector.load %arg5[%c0_0, %c0_1, %c0_2] : memref<1x16x16xf32, #tpu.memory_space<vmem>>, vector<1x16x16xf32>
    %2 = vector.shape_cast %1 : vector<1x16x16xf32> to vector<16x16xf32>
    %c0_3 = arith.constant 0 : index
    %c0_4 = arith.constant 0 : index
    %c0_5 = arith.constant 0 : index
    %3 = vector.load %arg6[%c0_3, %c0_4, %c0_5] : memref<2x16x16xf32, #tpu.memory_space<vmem>>, vector<1x16x16xf32>
    %4 = vector.shape_cast %3 : vector<1x16x16xf32> to vector<16x16xf32>
    %c1 = arith.constant 1 : index
    %c0_6 = arith.constant 0 : index
    %c0_7 = arith.constant 0 : index
    %5 = vector.load %arg6[%c1, %c0_6, %c0_7] : memref<2x16x16xf32, #tpu.memory_space<vmem>>, vector<1x16x16xf32>
    %6 = vector.shape_cast %5 : vector<1x16x16xf32> to vector<16x16xf32>
    %c0_8 = arith.constant 0 : index
    %c0_9 = arith.constant 0 : index
    %c0_10 = arith.constant 0 : index
    %7 = vector.load %arg7[%c0_8, %c0_9, %c0_10] : memref<2x16x16xf32, #tpu.memory_space<vmem>>, vector<1x16x16xf32>
    %8 = vector.shape_cast %7 : vector<1x16x16xf32> to vector<16x16xf32>
    %c1_11 = arith.constant 1 : index
    %c0_12 = arith.constant 0 : index
    %c0_13 = arith.constant 0 : index
    %9 = vector.load %arg7[%c1_11, %c0_12, %c0_13] : memref<2x16x16xf32, #tpu.memory_space<vmem>>, vector<1x16x16xf32>
    %10 = vector.shape_cast %9 : vector<1x16x16xf32> to vector<16x16xf32>
    %cst = arith.constant 0.000000e+00 : f32
    %11 = vector.broadcast %cst : f32 to vector<16x16xf32>
    %12 = arith.subf %11, %6 : vector<16x16xf32>
    %13 = vector.broadcast %0 : f32 to vector<16x16xf32>
    %14 = arith.mulf %13, %8 : vector<16x16xf32>
    %cst_14 = arith.constant 0.000000e+00 : f32
    %15 = arith.subf %cst_14, %0 : f32
    %16 = vector.broadcast %15 : f32 to vector<16x16xf32>
    %17 = arith.mulf %16, %10 : vector<16x16xf32>
    %c0_15 = arith.constant 0 : index
    %c0_16 = arith.constant 0 : index
    %c0_17 = arith.constant 0 : index
    %18 = vector.load %arg3[%c0_15, %c0_16, %c0_17] : memref<2x32x16xf32, #tpu.memory_space<vmem>>, vector<1x32x16xf32>
    %19 = vector.shape_cast %18 : vector<1x32x16xf32> to vector<32x16xf32>
    %c1_18 = arith.constant 1 : index
    %c0_19 = arith.constant 0 : index
    %c0_20 = arith.constant 0 : index
    %20 = vector.load %arg3[%c1_18, %c0_19, %c0_20] : memref<2x32x16xf32, #tpu.memory_space<vmem>>, vector<1x32x16xf32>
    %21 = vector.shape_cast %20 : vector<1x32x16xf32> to vector<32x16xf32>
    %cst_21 = arith.constant dense<0.000000e+00> : vector<32x16xf32>
    %22 = tpu.matmul %19, %8, %cst_21 {dimension_numbers = #tpu.dot_dimension_numbers<[1], [0], [0], [1], [0, 0, 1, 1], [], []>} : vector<32x16xf32>, vector<16x16xf32>, vector<32x16xf32> -> vector<32x16xf32>
    %cst_22 = arith.constant dense<0.000000e+00> : vector<32x16xf32>
    %23 = tpu.matmul %21, %10, %cst_22 {dimension_numbers = #tpu.dot_dimension_numbers<[1], [0], [0], [1], [0, 0, 1, 1], [], []>} : vector<32x16xf32>, vector<16x16xf32>, vector<32x16xf32> -> vector<32x16xf32>
    %24 = arith.addf %19, %21 : vector<32x16xf32>
    %25 = arith.addf %8, %10 : vector<16x16xf32>
    %cst_23 = arith.constant dense<0.000000e+00> : vector<32x16xf32>
    %26 = tpu.matmul %24, %25, %cst_23 {dimension_numbers = #tpu.dot_dimension_numbers<[1], [0], [0], [1], [0, 0, 1, 1], [], []>} : vector<32x16xf32>, vector<16x16xf32>, vector<32x16xf32> -> vector<32x16xf32>
    %27 = arith.subf %22, %23 : vector<32x16xf32>
    %28 = arith.subf %26, %22 : vector<32x16xf32>
    %29 = arith.subf %28, %23 : vector<32x16xf32>
    %30 = vector.extract_strided_slice %27 {offsets = [0, 0], sizes = [16, 16], strides = [1, 1]} : vector<32x16xf32> to vector<16x16xf32>
    %31 = vector.extract_strided_slice %29 {offsets = [0, 0], sizes = [16, 16], strides = [1, 1]} : vector<32x16xf32> to vector<16x16xf32>
    %cst_24 = arith.constant dense<0.000000e+00> : vector<16x16xf32>
    %32 = tpu.matmul %4, %30, %cst_24 {dimension_numbers = #tpu.dot_dimension_numbers<[1], [0], [0], [1], [0, 0, 1, 1], [], []>} : vector<16x16xf32>, vector<16x16xf32>, vector<16x16xf32> -> vector<16x16xf32>
    %cst_25 = arith.constant dense<0.000000e+00> : vector<16x16xf32>
    %33 = tpu.matmul %6, %31, %cst_25 {dimension_numbers = #tpu.dot_dimension_numbers<[1], [0], [0], [1], [0, 0, 1, 1], [], []>} : vector<16x16xf32>, vector<16x16xf32>, vector<16x16xf32> -> vector<16x16xf32>
    %34 = arith.addf %4, %6 : vector<16x16xf32>
    %35 = arith.addf %30, %31 : vector<16x16xf32>
    %cst_26 = arith.constant dense<0.000000e+00> : vector<16x16xf32>
    %36 = tpu.matmul %34, %35, %cst_26 {dimension_numbers = #tpu.dot_dimension_numbers<[1], [0], [0], [1], [0, 0, 1, 1], [], []>} : vector<16x16xf32>, vector<16x16xf32>, vector<16x16xf32> -> vector<16x16xf32>
    %37 = arith.subf %32, %33 : vector<16x16xf32>
    %38 = arith.subf %36, %32 : vector<16x16xf32>
    %39 = arith.subf %38, %33 : vector<16x16xf32>
    %c0_27 = arith.constant 0 : index
    %c0_28 = arith.constant 0 : index
    %c0_29 = arith.constant 0 : index
    %40 = vector.load %arg4[%c0_27, %c0_28, %c0_29] : memref<2x32x16xf32, #tpu.memory_space<vmem>>, vector<1x16x16xf32>
    %41 = vector.shape_cast %40 : vector<1x16x16xf32> to vector<16x16xf32>
    %42 = arith.subf %37, %41 : vector<16x16xf32>
    %43 = arith.mulf %2, %42 : vector<16x16xf32>
    %c1_30 = arith.constant 1 : index
    %c0_31 = arith.constant 0 : index
    %c0_32 = arith.constant 0 : index
    %44 = vector.load %arg4[%c1_30, %c0_31, %c0_32] : memref<2x32x16xf32, #tpu.memory_space<vmem>>, vector<1x16x16xf32>
    %45 = vector.shape_cast %44 : vector<1x16x16xf32> to vector<16x16xf32>
    %46 = arith.subf %39, %45 : vector<16x16xf32>
    %47 = arith.mulf %2, %46 : vector<16x16xf32>
    %cst_33 = arith.constant dense<0.000000e+00> : vector<16x16xf32>
    %48 = tpu.matmul %4, %43, %cst_33 {dimension_numbers = #tpu.dot_dimension_numbers<[1], [0], [0], [1], [0, 0, 1, 1], [], []>} : vector<16x16xf32>, vector<16x16xf32>, vector<16x16xf32> -> vector<16x16xf32>
    %cst_34 = arith.constant dense<0.000000e+00> : vector<16x16xf32>
    %49 = tpu.matmul %12, %47, %cst_34 {dimension_numbers = #tpu.dot_dimension_numbers<[1], [0], [0], [1], [0, 0, 1, 1], [], []>} : vector<16x16xf32>, vector<16x16xf32>, vector<16x16xf32> -> vector<16x16xf32>
    %50 = arith.addf %4, %12 : vector<16x16xf32>
    %51 = arith.addf %43, %47 : vector<16x16xf32>
    %cst_35 = arith.constant dense<0.000000e+00> : vector<16x16xf32>
    %52 = tpu.matmul %50, %51, %cst_35 {dimension_numbers = #tpu.dot_dimension_numbers<[1], [0], [0], [1], [0, 0, 1, 1], [], []>} : vector<16x16xf32>, vector<16x16xf32>, vector<16x16xf32> -> vector<16x16xf32>
    %53 = arith.subf %48, %49 : vector<16x16xf32>
    %54 = arith.subf %52, %48 : vector<16x16xf32>
    %55 = arith.subf %54, %49 : vector<16x16xf32>
    %c0_36 = arith.constant 0 : index
    %c0_37 = arith.constant 0 : index
    %c0_38 = arith.constant 0 : index
    %56 = vector.load %arg8[%c0_36, %c0_37, %c0_38] : memref<2x32x16xf32, #tpu.memory_space<vmem>>, vector<1x16x16xf32>
    %57 = vector.shape_cast %56 : vector<1x16x16xf32> to vector<16x16xf32>
    %58 = vector.shape_cast %53 : vector<16x16xf32> to vector<1x16x16xf32>
    tpu.vector_store %arg8[%c0_36, %c0_37, %c0_38], %58 {strides = array<i32>} : memref<2x32x16xf32, #tpu.memory_space<vmem>>, vector<1x16x16xf32>,
    %c1_39 = arith.constant 1 : index
    %c0_40 = arith.constant 0 : index
    %c0_41 = arith.constant 0 : index
    %59 = vector.load %arg8[%c1_39, %c0_40, %c0_41] : memref<2x32x16xf32, #tpu.memory_space<vmem>>, vector<1x16x16xf32>
    %60 = vector.shape_cast %59 : vector<1x16x16xf32> to vector<16x16xf32>
    %61 = vector.shape_cast %55 : vector<16x16xf32> to vector<1x16x16xf32>
    tpu.vector_store %arg8[%c1_39, %c0_40, %c0_41], %61 {strides = array<i32>} : memref<2x32x16xf32, #tpu.memory_space<vmem>>, vector<1x16x16xf32>,
    %62 = vector.extract_strided_slice %27 {offsets = [16, 0], sizes = [16, 16], strides = [1, 1]} : vector<32x16xf32> to vector<16x16xf32>
    %63 = vector.extract_strided_slice %29 {offsets = [16, 0], sizes = [16, 16], strides = [1, 1]} : vector<32x16xf32> to vector<16x16xf32>
    %cst_42 = arith.constant dense<0.000000e+00> : vector<16x16xf32>
    %64 = tpu.matmul %4, %62, %cst_42 {dimension_numbers = #tpu.dot_dimension_numbers<[1], [0], [0], [1], [0, 0, 1, 1], [], []>} : vector<16x16xf32>, vector<16x16xf32>, vector<16x16xf32> -> vector<16x16xf32>
    %cst_43 = arith.constant dense<0.000000e+00> : vector<16x16xf32>
    %65 = tpu.matmul %6, %63, %cst_43 {dimension_numbers = #tpu.dot_dimension_numbers<[1], [0], [0], [1], [0, 0, 1, 1], [], []>} : vector<16x16xf32>, vector<16x16xf32>, vector<16x16xf32> -> vector<16x16xf32>
    %66 = arith.addf %4, %6 : vector<16x16xf32>
    %67 = arith.addf %62, %63 : vector<16x16xf32>
    %cst_44 = arith.constant dense<0.000000e+00> : vector<16x16xf32>
    %68 = tpu.matmul %66, %67, %cst_44 {dimension_numbers = #tpu.dot_dimension_numbers<[1], [0], [0], [1], [0, 0, 1, 1], [], []>} : vector<16x16xf32>, vector<16x16xf32>, vector<16x16xf32> -> vector<16x16xf32>
    %69 = arith.subf %64, %65 : vector<16x16xf32>
    %70 = arith.subf %68, %64 : vector<16x16xf32>
    %71 = arith.subf %70, %65 : vector<16x16xf32>
    %c0_45 = arith.constant 0 : index
    %c16 = arith.constant 16 : index
    %c0_46 = arith.constant 0 : index
    %72 = vector.load %arg4[%c0_45, %c16, %c0_46] : memref<2x32x16xf32, #tpu.memory_space<vmem>>, vector<1x16x16xf32>
    %73 = vector.shape_cast %72 : vector<1x16x16xf32> to vector<16x16xf32>
    %74 = arith.subf %69, %73 : vector<16x16xf32>
    %75 = arith.mulf %2, %74 : vector<16x16xf32>
    %c1_47 = arith.constant 1 : index
    %c16_48 = arith.constant 16 : index
    %c0_49 = arith.constant 0 : index
    %76 = vector.load %arg4[%c1_47, %c16_48, %c0_49] : memref<2x32x16xf32, #tpu.memory_space<vmem>>, vector<1x16x16xf32>
    %77 = vector.shape_cast %76 : vector<1x16x16xf32> to vector<16x16xf32>
    %78 = arith.subf %71, %77 : vector<16x16xf32>
    %79 = arith.mulf %2, %78 : vector<16x16xf32>
    %cst_50 = arith.constant dense<0.000000e+00> : vector<16x16xf32>
    %80 = tpu.matmul %4, %75, %cst_50 {dimension_numbers = #tpu.dot_dimension_numbers<[1], [0], [0], [1], [0, 0, 1, 1], [], []>} : vector<16x16xf32>, vector<16x16xf32>, vector<16x16xf32> -> vector<16x16xf32>
    %cst_51 = arith.constant dense<0.000000e+00> : vector<16x16xf32>
    %81 = tpu.matmul %12, %79, %cst_51 {dimension_numbers = #tpu.dot_dimension_numbers<[1], [0], [0], [1], [0, 0, 1, 1], [], []>} : vector<16x16xf32>, vector<16x16xf32>, vector<16x16xf32> -> vector<16x16xf32>
    %82 = arith.addf %4, %12 : vector<16x16xf32>
    %83 = arith.addf %75, %79 : vector<16x16xf32>
    %cst_52 = arith.constant dense<0.000000e+00> : vector<16x16xf32>
    %84 = tpu.matmul %82, %83, %cst_52 {dimension_numbers = #tpu.dot_dimension_numbers<[1], [0], [0], [1], [0, 0, 1, 1], [], []>} : vector<16x16xf32>, vector<16x16xf32>, vector<16x16xf32> -> vector<16x16xf32>
    %85 = arith.subf %80, %81 : vector<16x16xf32>
    %86 = arith.subf %84, %80 : vector<16x16xf32>
    %87 = arith.subf %86, %81 : vector<16x16xf32>
    %c0_53 = arith.constant 0 : index
    %c16_54 = arith.constant 16 : index
    %c0_55 = arith.constant 0 : index
    %88 = vector.load %arg8[%c0_53, %c16_54, %c0_55] : memref<2x32x16xf32, #tpu.memory_space<vmem>>, vector<1x16x16xf32>
    %89 = vector.shape_cast %88 : vector<1x16x16xf32> to vector<16x16xf32>
    %90 = vector.shape_cast %85 : vector<16x16xf32> to vector<1x16x16xf32>
    tpu.vector_store %arg8[%c0_53, %c16_54, %c0_55], %90 {strides = array<i32>} : memref<2x32x16xf32, #tpu.memory_space<vmem>>, vector<1x16x16xf32>,
    %c1_56 = arith.constant 1 : index
    %c16_57 = arith.constant 16 : index
    %c0_58 = arith.constant 0 : index
    %91 = vector.load %arg8[%c1_56, %c16_57, %c0_58] : memref<2x32x16xf32, #tpu.memory_space<vmem>>, vector<1x16x16xf32>
    %92 = vector.shape_cast %91 : vector<1x16x16xf32> to vector<16x16xf32>
    %93 = vector.shape_cast %87 : vector<16x16xf32> to vector<1x16x16xf32>
    tpu.vector_store %arg8[%c1_56, %c16_57, %c0_58], %93 {strides = array<i32>} : memref<2x32x16xf32, #tpu.memory_space<vmem>>, vector<1x16x16xf32>,
    %c0_59 = arith.constant 0 : index
    %c0_60 = arith.constant 0 : index
    %c0_61 = arith.constant 0 : index
    %94 = vector.load %arg8[%c0_59, %c0_60, %c0_61] : memref<2x32x16xf32, #tpu.memory_space<vmem>>, vector<1x32x16xf32>
    %95 = vector.shape_cast %94 : vector<1x32x16xf32> to vector<32x16xf32>
    %c1_62 = arith.constant 1 : index
    %c0_63 = arith.constant 0 : index
    %c0_64 = arith.constant 0 : index
    %96 = vector.load %arg8[%c1_62, %c0_63, %c0_64] : memref<2x32x16xf32, #tpu.memory_space<vmem>>, vector<1x32x16xf32>
    %97 = vector.shape_cast %96 : vector<1x32x16xf32> to vector<32x16xf32>
    %cst_65 = arith.constant dense<0.000000e+00> : vector<32x16xf32>
    %98 = tpu.matmul %95, %14, %cst_65 {dimension_numbers = #tpu.dot_dimension_numbers<[1], [0], [0], [1], [0, 0, 1, 1], [], []>} : vector<32x16xf32>, vector<16x16xf32>, vector<32x16xf32> -> vector<32x16xf32>
    %cst_66 = arith.constant dense<0.000000e+00> : vector<32x16xf32>
    %99 = tpu.matmul %97, %17, %cst_66 {dimension_numbers = #tpu.dot_dimension_numbers<[1], [0], [0], [1], [0, 0, 1, 1], [], []>} : vector<32x16xf32>, vector<16x16xf32>, vector<32x16xf32> -> vector<32x16xf32>
    %100 = arith.addf %95, %97 : vector<32x16xf32>
    %101 = arith.addf %14, %17 : vector<16x16xf32>
    %cst_67 = arith.constant dense<0.000000e+00> : vector<32x16xf32>
    %102 = tpu.matmul %100, %101, %cst_67 {dimension_numbers = #tpu.dot_dimension_numbers<[1], [0], [0], [1], [0, 0, 1, 1], [], []>} : vector<32x16xf32>, vector<16x16xf32>, vector<32x16xf32> -> vector<32x16xf32>
    %103 = arith.subf %98, %99 : vector<32x16xf32>
    %104 = arith.subf %102, %98 : vector<32x16xf32>
    %105 = arith.subf %104, %99 : vector<32x16xf32>
    %c0_68 = arith.constant 0 : index
    %c0_69 = arith.constant 0 : index
    %c0_70 = arith.constant 0 : index
    %106 = vector.load %arg3[%c0_68, %c0_69, %c0_70] : memref<2x32x16xf32, #tpu.memory_space<vmem>>, vector<1x32x16xf32>
    %107 = vector.shape_cast %106 : vector<1x32x16xf32> to vector<32x16xf32>
    %108 = arith.subf %107, %103 : vector<32x16xf32>
    %c0_71 = arith.constant 0 : index
    %c0_72 = arith.constant 0 : index
    %c0_73 = arith.constant 0 : index
    %109 = vector.load %arg8[%c0_71, %c0_72, %c0_73] : memref<2x32x16xf32, #tpu.memory_space<vmem>>, vector<1x32x16xf32>
    %110 = vector.shape_cast %109 : vector<1x32x16xf32> to vector<32x16xf32>
    %111 = vector.shape_cast %108 : vector<32x16xf32> to vector<1x32x16xf32>
    tpu.vector_store %arg8[%c0_71, %c0_72, %c0_73], %111 {strides = array<i32>} : memref<2x32x16xf32, #tpu.memory_space<vmem>>, vector<1x32x16xf32>,
    %c1_74 = arith.constant 1 : index
    %c0_75 = arith.constant 0 : index
    %c0_76 = arith.constant 0 : index
    %112 = vector.load %arg3[%c1_74, %c0_75, %c0_76] : memref<2x32x16xf32, #tpu.memory_space<vmem>>, vector<1x32x16xf32>
    %113 = vector.shape_cast %112 : vector<1x32x16xf32> to vector<32x16xf32>
    %114 = arith.subf %113, %105 : vector<32x16xf32>
    %c1_77 = arith.constant 1 : index
    %c0_78 = arith.constant 0 : index
    %c0_79 = arith.constant 0 : index
    %115 = vector.load %arg8[%c1_77, %c0_78, %c0_79] : memref<2x32x16xf32, #tpu.memory_space<vmem>>, vector<1x32x16xf32>
    %116 = vector.shape_cast %115 : vector<1x32x16xf32> to vector<32x16xf32>
    %117 = vector.shape_cast %114 : vector<32x16xf32> to vector<1x32x16xf32>
    tpu.vector_store %arg8[%c1_77, %c0_78, %c0_79], %117 {strides = array<i32>} : memref<2x32x16xf32, #tpu.memory_space<vmem>>, vector<1x32x16xf32>,
    return
  }
  func.func @transform_0(%arg0: i32, %arg1: i32) -> i32 {
    %c0_i32 = arith.constant 0 : i32
    %c0_i32_0 = arith.constant 0 : i32
    return %c0_i32 : i32
  }
  func.func @transform_1(%arg0: i32, %arg1: i32) -> (i32, i32, i32) {
    %c2_i32 = arith.constant 2 : i32
    %0 = arith.muli %arg0, %c2_i32 : i32
    %1 = arith.addi %0, %arg1 : i32
    %c0_i32 = arith.constant 0 : i32
    %c0_i32_0 = arith.constant 0 : i32
    %c0_i32_1 = arith.constant 0 : i32
    return %c0_i32, %1, %c0_i32_0 : i32, i32, i32
  }
  func.func @transform_2(%arg0: i32, %arg1: i32) -> (i32, i32, i32) {
    %c2_i32 = arith.constant 2 : i32
    %0 = arith.muli %arg0, %c2_i32 : i32
    %1 = arith.addi %0, %arg1 : i32
    %c0_i32 = arith.constant 0 : i32
    %c0_i32_0 = arith.constant 0 : i32
    %c0_i32_1 = arith.constant 0 : i32
    return %c0_i32, %1, %c0_i32_0 : i32, i32, i32
  }
  func.func @transform_3(%arg0: i32, %arg1: i32) -> (i32, i32, i32) {
    %c0_i32 = arith.constant 0 : i32
    %c0_i32_0 = arith.constant 0 : i32
    %c0_i32_1 = arith.constant 0 : i32
    return %arg0, %c0_i32, %c0_i32_0 : i32, i32, i32
  }
  func.func @transform_4(%arg0: i32, %arg1: i32) -> (i32, i32, i32) {
    %c0_i32 = arith.constant 0 : i32
    %c0_i32_0 = arith.constant 0 : i32
    %c0_i32_1 = arith.constant 0 : i32
    %c0_i32_2 = arith.constant 0 : i32
    return %c0_i32, %c0_i32_0, %c0_i32_1 : i32, i32, i32
  }
  func.func @transform_5(%arg0: i32, %arg1: i32) -> (i32, i32, i32) {
    %c0_i32 = arith.constant 0 : i32
    %c0_i32_0 = arith.constant 0 : i32
    %c0_i32_1 = arith.constant 0 : i32
    %c0_i32_2 = arith.constant 0 : i32
    return %c0_i32, %c0_i32_0, %c0_i32_1 : i32, i32, i32
  }
  func.func @transform_6(%arg0: i32, %arg1: i32) -> (i32, i32, i32) {
    %c2_i32 = arith.constant 2 : i32
    %0 = arith.muli %arg0, %c2_i32 : i32
    %1 = arith.addi %0, %arg1 : i32
    %c0_i32 = arith.constant 0 : i32
    %c0_i32_0 = arith.constant 0 : i32
    %c0_i32_1 = arith.constant 0 : i32
    return %c0_i32, %1, %c0_i32_0 : i32, i32, i32
  }
}

</mosaic_0001>

<bundles_post_ra>
// kernel: _forward_impl.1
= control target key start
LH: loop header
LB: loop body
LE: loop exit
PB: predicated region body
PF: predicated region fallthrough
CT: control target
= control target key end

     0   :  { %s3202_s0 = inlined_call_operand.<no memory space> [shape: f32[1], index: 0, kind: input, shape index: {}]   ;;  %s3203_s1 = inlined_call_operand.vmem [shape: f32[2,128,16], index: 1, kind: input, shape index: {}]   ;;  %s3204_s2 = inlined_call_operand.vmem [shape: f32[2,128,16], index: 2, kind: input, shape index: {}]   ;;  %s3205_s3 = inlined_call_operand.vmem [shape: f32[2,16,16], index: 3, kind: input, shape index: {}]   ;;  %s3206_s4 = inlined_call_operand.vmem [shape: f32[2,16,16], index: 4, kind: input, shape index: {}, may-alias: {4,5}]   ;;  %s3207_s5 = inlined_call_operand.vmem [shape: f32[2,16,16], index: 5, kind: input, shape index: {}, may-alias: {4,5}]   ;;  %s3208_s6 = inlined_call_operand.vmem [shape: f32[2,128,16], index: 6, kind: output, shape index: {}]  }
   0x1   :  { %11 = sst [smem:[#allocation2]] %s3202_s0 }
   0x2   :  { %s2803_s23 = smov 0   ;;  %s2805_s24 = smov 0  }
   0x3   :  { %s2807_s25 = smov 0   ;;  %s2809_s26 = smov 0  }
   0x4   :  { %s2811_s27 = smov 0   ;;  %s2813_s28 = smov 0  }
   0x5   :  { %s2815_s29 = smov 0  }
   0x6 LB: > { %s26_s0 = sadd.s32 1, %s2755_s27  ;;  %s29_s30 = sadd.s32 1, %s2759_s28  ;;  %s2763_s29 = sphi %s2815_s29, %s17_s29   ;;  %s2759_s28 = sphi %s2813_s28, %s3216_s28   ;;  %s2755_s27 = sphi %s2811_s27, %s3215_s27   ;;  %s2751_s26 = sphi %s2809_s26, %s3214_s26   ;;  %s2747_s25 = sphi %s2807_s25, %s3213_s25   ;;  %s2743_s24 = sphi %s2805_s24, %s3212_s24   ;;  %s2739_s23 = sphi %s2803_s23, %s3211_s23  }
   0x7   : > { %p27_p0 = scmp.ge.s32.totalorder %s26_s0, 2  ;;  %s2311_s7 = sadd.s32 4294967295, %s2763_s29  }
   0x8   : > { %s2313_s8 = sshll.u32 %s2759_s28, 1  ;;  %p68_p1 = scmp.ne.s32.totalorder %s2743_s24, %s2739_s23 }
   0x9   : > { %s3218_s0 = smov (%p27_p0, %s26_s0), 0  ;;  %s3220_s30 = smov (!%p27_p0, %s29_s30), %s2759_s28 }
   0xa   : > { %p31_p2 = scmp.ge.s32.totalorder %s3220_s30, 2  ;;  %p69_p3 = scmp.eq.s32.totalorder %s2763_s29, 0 }
   0xb   : > { %s2849_s9 = sadd.s32 %s2755_s27, %s2313_s8  ;;  %p200_p4 = scmp.eq.s32.totalorder %s2311_s7, 3 }
   0xc   : > { %s3222_s30 = smov (%p31_p2, %s3220_s30), 0  ;;  %p2853_p5 = por %p69_p3, %p68_p1 }
   0xd   : > { %p2857_p6 = por %p200_p4, %p68_p1  ;;  %s2314_s12 = sshll.u32 %s3222_s30, 1 }
   0xe   : > { %s57_s13 = sadd.s32 %s2314_s12, %s3218_s0  ;;  %s61_s15 = sadd.s32 1, %s2743_s24 }
   0xf   : > { %s58_s14 = ssub.s32 %s2849_s9, %s57_s13  ;;  %p2320_p8 = scmp.ge.s32.totalorder %s2763_s29, 4 }
  0x10   : > { %p59_p7 = scmp.eq.s32.totalorder %s58_s14, 0 }
  0x11   : > { %231 = sbr.rel (%p2320_p8) target bundleno = 38 (0x26), region = 28 }
  0x12   : > { %s2866_s16 = scalar_select %p59_p7, %s2743_s24, %s61_s15  }
  0x16   : > { %234 = sbr.rel (!%p2853_p5) target bundleno = 30 (0x1e), region = 32  ;;  %s236_s17 = sand.u32 (%p2853_p5), 1, %s2743_s24  }
  0x17   : > { %s2417_s18 = sshll.u32 (%p2853_p5), %s2849_s9, 5  ;;  %s2321_s19 = sshll.u32 (%p2853_p5), %s236_s17, 6 }
  0x18   : > { %s243_s22 = scalar_lea.vmem (%p2853_p5), %s3203_s1, %s2417_s18  ;;  %s238_s7 = scalar_lea.vmem (%p2853_p5), [#allocation3], %s2321_s19 }
  0x19   : > { %v286_v0 = vld [vmem:[%s243_s22] sm:$0xff] (%p2853_p5)  ;;  %v288_v1 = vld [vmem:[%s243_s22 + $0x8] sm:$0xff] (%p2853_p5)  ;;  %v290_v2 = vld [vmem:[%s243_s22 + $0x10] sm:$0xff] (%p2853_p5) }
  0x1a   : > { %287 = vst [vmem:[%s238_s7] sm:$0xff] (%p2853_p5), %v286_v0  ;;  %289 = vst [vmem:[%s238_s7 + $0x8] sm:$0xff] (%p2853_p5), %v288_v1  ;;  %v292_v3 = vld [vmem:[%s243_s22 + $0x18] sm:$0xff] (%p2853_p5)  ;;  %v294_v4 = vld [vmem:[%s243_s22 + $0x80] sm:$0xff] (%p2853_p5) }
  0x1b   : > { %291 = vst [vmem:[%s238_s7 + $0x10] sm:$0xff] %v290_v2  ;;  %v296_v5 = vld [vmem:[%s243_s22 + $0x88] sm:$0xff]  ;;  %293 = vst [vmem:[%s238_s7 + $0x18] sm:$0xff] %v292_v3  ;;  %v298_v6 = vld [vmem:[%s243_s22 + $0x90] sm:$0xff] }
  0x1c   : > { %295 = vst [vmem:[%s238_s7 + $0x20] sm:$0xff] %v294_v4  ;;  %297 = vst [vmem:[%s238_s7 + $0x28] sm:$0xff] %v296_v5  ;;  %v300_v7 = vld [vmem:[%s243_s22 + $0x98] sm:$0xff] }
  0x1d   : > { %299 = vst [vmem:[%s238_s7 + $0x30] sm:$0xff] %v298_v6  ;;  %301 = vst [vmem:[%s238_s7 + $0x38] sm:$0xff] %v300_v7 }
  0x1e PF: > { %307 = sbr.rel (!%p2853_p5) target bundleno = 38 (0x26), region = 70  ;;  %s309_s8 = sand.u32 (%p2853_p5), 1, %s2743_s24  }
  0x1f   : > { %s2418_s12 = sshll.u32 (%p2853_p5), %s2849_s9, 5  ;;  %s2325_s13 = sshll.u32 (%p2853_p5), %s309_s8, 6 }
  0x20   : > { %s316_s17 = scalar_lea.vmem (%p2853_p5), %s3204_s2, %s2418_s12  ;;  %s311_s18 = scalar_lea.vmem (%p2853_p5), [#allocation4], %s2325_s13 }
  0x21   : > { %v359_v8 = vld [vmem:[%s316_s17] sm:$0xff] (%p2853_p5)  ;;  %v361_v9 = vld [vmem:[%s316_s17 + $0x8] sm:$0xff] (%p2853_p5)  ;;  %v363_v10 = vld [vmem:[%s316_s17 + $0x10] sm:$0xff] (%p2853_p5) }
  0x22   : > { %360 = vst [vmem:[%s311_s18] sm:$0xff] (%p2853_p5), %v359_v8  ;;  %362 = vst [vmem:[%s311_s18 + $0x8] sm:$0xff] (%p2853_p5), %v361_v9  ;;  %v365_v11 = vld [vmem:[%s316_s17 + $0x18] sm:$0xff] (%p2853_p5)  ;;  %v367_v12 = vld [vmem:[%s316_s17 + $0x80] sm:$0xff] (%p2853_p5) }
  0x23   : > { %364 = vst [vmem:[%s311_s18 + $0x10] sm:$0xff] %v363_v10  ;;  %v369_v13 = vld [vmem:[%s316_s17 + $0x88] sm:$0xff]  ;;  %366 = vst [vmem:[%s311_s18 + $0x18] sm:$0xff] %v365_v11  ;;  %v371_v14 = vld [vmem:[%s316_s17 + $0x90] sm:$0xff] }
  0x24   : > { %368 = vst [vmem:[%s311_s18 + $0x20] sm:$0xff] %v367_v12  ;;  %370 = vst [vmem:[%s311_s18 + $0x28] sm:$0xff] %v369_v13  ;;  %v373_v15 = vld [vmem:[%s316_s17 + $0x98] sm:$0xff] }
  0x25   : > { %372 = vst [vmem:[%s311_s18 + $0x30] sm:$0xff] %v371_v14  ;;  %374 = vst [vmem:[%s311_s18 + $0x38] sm:$0xff] %v373_v15 }
  0x26 PF: > { %p2329_p9 = scmp.ge.s32.totalorder %s2763_s29, 1  ;;  %p387_p10 = scmp.lt.s32.totalorder %s2763_s29, 5 }
  0x28   : > { %p388_p11 = pnand %p2329_p9, %p387_p10 }
  0x29   : > { %s394_s21 = sand.u32 (!%p388_p11), 1, %s2739_s23   ;;  %p444_p12 = scmp.lt.s32.totalorder (!%p388_p11), %s2751_s26, 1 }
  0x2a   : > { %391 = sbr.rel (%p388_p11) target bundleno = 1109 (0x455), region = 112  ;;  %s2903_s8 = sshll.u32 (!%p388_p11), %s394_s21, 6 }
  0x2b   : > { %s396_s23 = scalar_lea.vmem (!%p388_p11), [#allocation3], %s2903_s8  ;;  %s3080_s14 = scalar_lea.vmem (!%p388_p11), [#allocation5], %s2903_s8 }
  0x2f   : > { %v2888_v16 = vld [vmem:[%s3207_s5 + $0x8] sm:$0xff]  ;;  %v2893_v17 = vld [vmem:[%s3207_s5] sm:$0xff]  ;;  %v2899_v18 = vld [vmem:[%s3207_s5 + $0x18] sm:$0xff]  ;;  %vm483_vm0 = vcmask 130048   ;;  %s445_s21 = scalar_select %p444_p12, %s2751_s26, 1 }
  0x30   : > { %2505 = vmatprep.subr.mxu0 %v2888_v16  ;;  %2649 = vmatprep.subr.mxu1 %v2888_v16  ;;  %v2910_v19 = vld [vmem:[%s3207_s5 + $0x10] sm:$0xff]  ;;  %v2915_v20 = vld [vmem:[%s396_s23] sm:$0xff]  ;;  %v683_v22 = vadd.f32 %v2899_v18, %v2888_v16  ;;  %v2925_v24 = vld [vmem:[%s396_s23 + $0x8] sm:$0xff]  ;;  %s2412_s17 = sshll.u32 (%p2857_p6), %s2751_s26, 1 }
  0x31   : > { %2506 = vmatpush3.msra.mxu0 %v2888_v16  ;;  %2651 = vmatpush3.msra.mxu1 %v2888_v16  ;;  %v2917_v21 = vld [vmem:[%s396_s23 + $0x10] sm:$0xff]  ;;  %v2923_v23 = vld [vmem:[%s396_s23 + $0x20] sm:$0xff]  ;;  %v2931_v25 = vld [vmem:[%s396_s23 + $0x28] sm:$0xff]  ;;  %v682_v27 = vadd.f32 %v2910_v19, %v2893_v17  ;;  %s2419_s22 = sshll.u32 %s445_s21, 4  ;;  %s2142_s18 = sadd.s32 (%p2857_p6), %s2747_s25, %s2412_s17 }
  0x32   : > { %2507 = vmatprep.subr.mxu0 %v2893_v17  ;;  %2650 = vmatprep.subr.mxu1 %v2893_v17  ;;  %v2933_v26 = vld [vmem:[%s396_s23 + $0x18] sm:$0xff]  ;;  %v2937_v28 = vld [vmem:[%s396_s23 + $0x30] sm:$0xff]  ;;  %v678_v29 = vadd.f32 %v2923_v23, %v2915_v20  ;;  %v679_v30 = vadd.f32 %v2931_v25, %v2925_v24  ;;  %v2972_v34 = vld [vmem:[%s3206_s4] sm:$0xff]  ;;  %s448_s13 = scalar_lea.vmem %s3205_s3, %s2419_s22  ;;  %s2420_s11 = sshll.u32 (%p2857_p6), %s2142_s18, 5 }
  0x33   : > { %2508 = vmatpush3.msra.mxu0 %v2893_v17  ;;  %2652 = vmatpush3.msra.mxu1 %v2893_v17  ;;  %v680_v31 = vadd.f32 %v2937_v28, %v2917_v21  ;;  %v2952_v32 = vld [vmem:[%s396_s23 + $0x38] sm:$0xff]  ;;  %v2979_v35 = vld [vmem:[%s3206_s4 + $0x10] sm:$0xff]  ;;  %v2994_v50 = vld [vmem:[%s3206_s4 + $0x8] sm:$0xff]  ;;  %s3026_s23 = scalar_lea.vmem [#allocation4], %s2903_s8  ;;  %s3091_s8 = sld [smem:[#allocation2]] }
  0x34   : > { %2509 = vmatprep.mubr.msk.f32.mxu0 %vm483_vm0, %v2915_v20  ;;  %2512 = vmatprep.mubr.msk.f32.mxu1 %vm483_vm0, %v2917_v21  ;;  %v681_v33 = vadd.f32 %v2952_v32, %v2933_v26  ;;  %v2983_v36 = vadd.f32 %v2979_v35, %v2972_v34  ;;  %v2999_v53 = vld [vmem:[%s3206_s4 + $0x18] sm:$0xff]  ;;  %v3016_v56 = vsub.f32 0.0, %v2979_v35  ;;  %v1047_v0 = vld [vmem:[%s3026_s23 + $0x8] sm:$0xff]  ;;  %v1046_v6 = vld [vmem:[%s3026_s23] sm:$0xff]  ;;  %s2145_s19 = scalar_lea.vmem (%p2857_p6), %s3208_s6, %s2420_s11 }
  0x35   : > { %2510 = vmatmul.mubr.msk.f32.vlgmr.msra.gmra.mxu0 %vm483_vm0, %v2925_v24  ;;  %2513 = vmatmul.mubr.msk.f32.vlgmr.msra.gmra.mxu1 %vm483_vm0, %v2933_v26  ;;  %v3005_v55 = vadd.f32 %v2999_v53, %v2994_v50  ;;  %v2362_v4 = vld [vmem:[%s3026_s23 + $0x28] sm:$0xff]  ;;  %v2361_v13 = vld [vmem:[%s3026_s23 + $0x20] sm:$0xff] }
  0x36   : > { %2515 = vmatprep.subr.mxu1 %v2899_v18  ;;  %2525 = vmatprep.subr.mxu0 %v683_v22  ;;  %v3031_v8 = vld [vmem:[%s448_s13 + $0x8] sm:$0xff]  ;;  %v3034_v14 = vld [vmem:[%s448_s13] sm:$0xff] }
  0x37   : > { %2516 = vmatpush3.msra.mxu1 %v2899_v18  ;;  %2526 = vmatpush3.msra.mxu0 %v683_v22 }
  0x38   : > { %2517 = vmatprep.subr.mxu1 %v2910_v19  ;;  %2527 = vmatprep.subr.mxu0 %v682_v27 }
  0x39   : > { %2518 = vmatpush3.msra.mxu1 %v2910_v19  ;;  %2519 = vmatprep.mubr.msk.f32.mxu1 %vm483_vm0, %v2923_v23  ;;  %s470_s15 = ssub.f32 0.0, %s3091_s8 }
  0x3a   : > { %2528 = vmatpush3.msra.mxu0 %v682_v27  ;;  %2529 = vmatprep.mubr.msk.f32.mxu0 %vm483_vm0, %v678_v29 }
  0x3b   : > { %2520 = vmatmul.mubr.msk.f32.vlgmr.msra.gmra.mxu1 %vm483_vm0, %v2931_v25  ;;  %2530 = vmatmul.mubr.msk.f32.vlgmr.msra.gmra.mxu0 %vm483_vm0, %v679_v30 }
  0x3c   : > { %2522 = vmatprep.mubr.msk.f32.mxu1 %vm483_vm0, %v2937_v28  ;;  %2532 = vmatprep.mubr.msk.f32.mxu0 %vm483_vm0, %v680_v31 }
  0x3f   : > { %2523 = vmatmul.mubr.msk.f32.gmra.mxu1 %vm483_vm0, %v2952_v32  ;;  %2533 = vmatmul.mubr.msk.f32.gmra.mxu0 %vm483_vm0, %v681_v33 }
  0x40   : > { %2539 = vmatprep.mubr.msk.f32.mxu1 %vm483_vm0, %v2972_v34  ;;  %2553 = vmatprep.mubr.msk.f32.mxu0 %vm483_vm0, %v2983_v36 }
  0xf5   : > { %v2511_v37 = vpop.f32.mrf.mxu0  ;;  %v2987_v38 = vpop.f32.mrf.mxu1 }
  0xf7   : > { %v562_v39 = vpop.f32.mrf.mxu0  ;;  %v2989_v40 = vpop.f32.mrf.mxu1 }
  0xfb   : > { %v2521_v41 = vpop.f32.mrf.mxu1  ;;  %v2531_v42 = vpop.f32.mrf.mxu0 }
  0xfc   : > { %v782_v43 = vsub.f32 %v2511_v37, %v2521_v41  ;;  %v786_v44 = vsub.f32 %v2531_v42, %v2511_v37  ;;  %v3040_v37 = vsub.f32 0.0, %v2999_v53 }
  0xfd   : > { %v659_v45 = vpop.f32.mrf.mxu1  ;;  %v762_v46 = vpop.f32.mrf.mxu0 }
  0xfe   : > { %v790_v47 = vsub.f32 %v786_v44, %v2521_v41  ;;  %v781_v48 = vsub.f32 %v562_v39, %v659_v45  ;;  %v785_v49 = vsub.f32 %v762_v46, %v562_v39  ;;  %2535 = vmatprep.subr.mxu1 %v782_v43  ;;  %v3048_v44 = vadd.f32 %v3016_v56, %v2972_v34 }
  0xff   : > { %2536 = vmatpush3.msra.mxu1 %v782_v43  ;;  %v2524_v57 = vpop.f32.mrf.mxu1  ;;  %v2534_v59 = vpop.f32.mrf.mxu0  ;;  %v3053_v46 = vadd.f32 %v3040_v37, %v2994_v50 }
 0x100   : > { %v789_v51 = vsub.f32 %v785_v49, %v659_v45  ;;  %2537 = vmatprep.subr.mxu1 %v781_v48  ;;  %v958_v52 = vadd.f32 %v790_v47, %v782_v43  ;;  %v788_v42 = vsub.f32 %v2534_v59, %v2987_v38  ;;  %v784_v45 = vsub.f32 %v2987_v38, %v2524_v57 }
 0x101   : > { %2538 = vmatpush3.msra.mxu1 %v781_v48  ;;  %v669_v58 = vpop.f32.mrf.mxu1  ;;  %v772_v62 = vpop.f32.mrf.mxu0 }
 0x102   : > { %2540 = vmatmul.mubr.msk.f32.vlgmr.msra.gmra.mxu1 %vm483_vm0, %v2994_v50  ;;  %2542 = vmatprep.subr.mxu1 %v790_v47  ;;  %v957_v54 = vadd.f32 %v789_v51, %v781_v48  ;;  %v792_v48 = vsub.f32 %v788_v42, %v2524_v57  ;;  %v783_v49 = vsub.f32 %v2989_v40, %v669_v58 }
 0x103   : > { %2549 = vmatprep.subr.mxu0 %v958_v52  ;;  %2543 = vmatpush3.msra.mxu1 %v790_v47  ;;  %v787_v47 = vsub.f32 %v772_v62, %v2989_v40 }
 0x104   : > { %2550 = vmatpush3.msra.mxu0 %v958_v52  ;;  %2544 = vmatprep.subr.mxu1 %v789_v51 }
 0x105   : > { %2551 = vmatprep.subr.mxu0 %v957_v54  ;;  %2545 = vmatpush3.msra.mxu1 %v789_v51  ;;  %v791_v38 = vsub.f32 %v787_v47, %v669_v58  ;;  %v1462_v51 = vadd.f32 %v792_v48, %v784_v45 }
 0x106   : > { %2546 = vmatprep.mubr.msk.f32.mxu1 %vm483_vm0, %v2979_v35  ;;  %2552 = vmatpush3.msra.mxu0 %v957_v54 }
 0x107   : > { %2547 = vmatmul.mubr.msk.f32.vlgmr.msra.gmra.mxu1 %vm483_vm0, %v2999_v53  ;;  %2554 = vmatmul.mubr.msk.f32.vlgmr.msra.gmra.mxu0 %vm483_vm0, %v3005_v55  ;;  %v1461_v40 = vadd.f32 %v791_v38, %v783_v49 }
 0x108   : > { %2560 = vmatprep.mubr.msk.f32.mxu1 %vm483_vm0, %v2972_v34  ;;  %2567 = vmatprep.mubr.msk.f32.mxu0 %vm483_vm0, %v3016_v56 }
 0x1c2   : > { %v2541_v60 = vpop.f32.mrf.mxu1 }
 0x1c4   : > { %v865_v61 = vpop.f32.mrf.mxu1 }
 0x1c7   : > { %v2548_v63 = vpop.f32.mrf.mxu1  ;;  %v2555_v1 = vpop.f32.mrf.mxu0 }
 0x1c8   : > { %v1041_v2 = vsub.f32 %v2541_v60, %v2548_v63  ;;  %v1043_v3 = vsub.f32 %v2555_v1, %v2541_v60 }
 0x1c9   : > { %v946_v5 = vpop.f32.mrf.mxu1  ;;  %v1031_v7 = vpop.f32.mrf.mxu0 }
 0x1ca   : > { %v1049_v9 = vsub.f32 %v1041_v2, %v1047_v0  ;;  %v1045_v10 = vsub.f32 %v1043_v3, %v2548_v63  ;;  %v1040_v11 = vsub.f32 %v865_v61, %v946_v5  ;;  %v1042_v12 = vsub.f32 %v1031_v7, %v865_v61  ;;  %v1545_v0 = vld [vmem:[%s3026_s23 + $0x18] sm:$0xff]  ;;  %v1544_v3 = vld [vmem:[%s3026_s23 + $0x10] sm:$0xff] }
 0x1cc   : > { %v1056_v15 = vsub.f32 %v1045_v10, %v2362_v4  ;;  %v1048_v22 = vsub.f32 %v1040_v11, %v1046_v6  ;;  %v1044_v27 = vsub.f32 %v1042_v12, %v946_v5  ;;  %v1051_v29 = vmul.f32 %v1049_v9, %v3031_v8  ;;  %v2378_v10 = vld [vmem:[%s3026_s23 + $0x38] sm:$0xff] }
 0x1ce   : > { %v1055_v30 = vsub.f32 %v1044_v27, %v2361_v13  ;;  %2556 = vmatprep.subr.mxu1 %v1051_v29  ;;  %v1050_v31 = vmul.f32 %v1048_v22, %v3034_v14  ;;  %v1058_v33 = vmul.f32 %v1056_v15, %v3031_v8  ;;  %v2377_v22 = vld [vmem:[%s3026_s23 + $0x30] sm:$0xff] }
 0x1cf   : > { %2557 = vmatpush3.msra.mxu1 %v1051_v29 }
 0x1d0   : > { %2558 = vmatprep.subr.mxu1 %v1050_v31  ;;  %2563 = vmatprep.subr.mxu0 %v1058_v33  ;;  %v1057_v39 = vmul.f32 %v1055_v30, %v3034_v14  ;;  %v1218_v41 = vadd.f32 %v1058_v33, %v1051_v29 }
 0x1d1   : > { %2559 = vmatpush3.msra.mxu1 %v1050_v31  ;;  %2564 = vmatpush3.msra.mxu0 %v1058_v33 }
 0x1d2   : > { %2561 = vmatmul.mubr.msk.f32.vlgmr.msra.gmra.mxu1 %vm483_vm0, %v2994_v50  ;;  %2565 = vmatprep.subr.mxu0 %v1057_v39  ;;  %v1217_v43 = vadd.f32 %v1057_v39, %v1050_v31 }
 0x1d3   : > { %2570 = vmatprep.subr.mxu1 %v1218_v41  ;;  %2566 = vmatpush3.msra.mxu0 %v1057_v39  ;;  %v467_v39 = vstv %s3091_s8 }
 0x1d4   : > { %2571 = vmatpush3.msra.mxu1 %v1218_v41  ;;  %2568 = vmatmul.mubr.msk.f32.vlgmr.msra.gmra.mxu0 %vm483_vm0, %v3040_v37 }
 0x1d5   : > { %2572 = vmatprep.subr.mxu1 %v1217_v43  ;;  %2577 = vmatprep.subr.mxu0 %v784_v45 }
 0x1d6   : > { %2573 = vmatpush3.msra.mxu1 %v1217_v43  ;;  %2574 = vmatprep.mubr.msk.f32.mxu1 %vm483_vm0, %v3048_v44  ;;  %v469_v43 = vmul.f32 %v467_v39, %v2888_v16 }
 0x1d7   : > { %2578 = vmatpush3.msra.mxu0 %v784_v45  ;;  %2575 = vmatmul.mubr.msk.f32.vlgmr.msra.gmra.mxu1 %vm483_vm0, %v3053_v46  ;;  %v471_v45 = vstv %s470_s15 }
 0x1d8   : > { %2579 = vmatprep.subr.mxu0 %v783_v49  ;;  %2584 = vmatprep.subr.mxu1 %v792_v48 }
 0x1d9   : > { %2580 = vmatpush3.msra.mxu0 %v783_v49  ;;  %2581 = vmatprep.mubr.msk.f32.mxu0 %vm483_vm0, %v2972_v34 }
 0x1da   : > { %2585 = vmatpush3.msra.mxu1 %v792_v48  ;;  %2582 = vmatmul.mubr.msk.f32.vlgmr.msra.gmra.mxu0 %vm483_vm0, %v2994_v50 }
 0x1db   : > { %2586 = vmatprep.subr.mxu1 %v791_v38  ;;  %2591 = vmatprep.subr.mxu0 %v1462_v51 }
 0x1dc   : > { %2587 = vmatpush3.msra.mxu1 %v791_v38  ;;  %2588 = vmatprep.mubr.msk.f32.mxu1 %vm483_vm0, %v2979_v35 }
 0x1dd   : > { %2592 = vmatpush3.msra.mxu0 %v1462_v51  ;;  %2589 = vmatmul.mubr.msk.f32.vlgmr.msra.gmra.mxu1 %vm483_vm0, %v2999_v53 }
 0x1de   : > { %2593 = vmatprep.subr.mxu0 %v1461_v40  ;;  %2595 = vmatprep.mubr.msk.f32.mxu0 %vm483_vm0, %v2983_v36 }
 0x1df   : > { %2594 = vmatpush3.msra.mxu0 %v1461_v40  ;;  %2602 = vmatprep.mubr.msk.f32.mxu1 %vm483_vm0, %v2972_v34 }
 0x1e0   : > { %2596 = vmatmul.mubr.msk.f32.vlgmr.msra.gmra.mxu0 %vm483_vm0, %v3005_v55 }
 0x1e1   : > { %2609 = vmatprep.mubr.msk.f32.mxu0 %vm483_vm0, %v3016_v56 }
 0x292   : > { %v2562_v35 = vpop.f32.mrf.mxu1 }
 0x294   : > { %v1125_v52 = vpop.f32.mrf.mxu1  ;;  %v2569_v54 = vpop.f32.mrf.mxu0 }
 0x295   : > { %v1301_v57 = vsub.f32 %v2562_v35, %v2569_v54 }
 0x296   : > { %v1206_v53 = vpop.f32.mrf.mxu0 }
 0x297   : > { %1307 = vst.msk [vmem:[%s3080_s14 + $0x8] sm:$0xff] %vm483_vm0, %v1301_v57  ;;  %v1300_v34 = vsub.f32 %v1125_v52, %v1206_v53  ;;  %v2576_v36 = vpop.f32.mrf.mxu1 }
 0x298   : > { %v1303_v55 = vsub.f32 %v2576_v36, %v2562_v35 }
 0x299   : > { %1306 = vst.msk [vmem:[%s3080_s14] sm:$0xff] %vm483_vm0, %v1300_v34  ;;  %v1291_v56 = vpop.f32.mrf.mxu1 }
 0x29a   : > { %v1305_v58 = vsub.f32 %v1303_v55, %v2569_v54  ;;  %v1302_v59 = vsub.f32 %v1291_v56, %v1125_v52  ;;  %v2583_v60 = vpop.f32.mrf.mxu0 }
 0x29c   : > { %2370 = vst.msk [vmem:[%s3080_s14 + $0x28] sm:$0xff] %vm483_vm0, %v1305_v58  ;;  %v1304_v61 = vsub.f32 %v1302_v59, %v1206_v53  ;;  %v1377_v62 = vpop.f32.mrf.mxu0 }
 0x29d   : > { %v2590_v63 = vpop.f32.mrf.mxu1 }
 0x29e   : > { %2369 = vst.msk [vmem:[%s3080_s14 + $0x20] sm:$0xff] %vm483_vm0, %v1304_v61  ;;  %v1539_v1 = vsub.f32 %v2583_v60, %v2590_v63 }
 0x29f   : > { %v1452_v2 = vpop.f32.mrf.mxu1 }
 0x2a0   : > { %v1547_v4 = vsub.f32 %v1539_v1, %v1545_v0  ;;  %v1538_v5 = vsub.f32 %v1377_v62, %v1452_v2  ;;  %v2597_v6 = vpop.f32.mrf.mxu0  ;;  %v1793_v16 = vld [vmem:[%s3080_s14] sm:$0xff] }
 0x2a1   : > { %v1541_v7 = vsub.f32 %v2597_v6, %v2583_v60 }
 0x2a2   : > { %v1546_v9 = vsub.f32 %v1538_v5, %v1544_v3  ;;  %v1529_v11 = vpop.f32.mrf.mxu0  ;;  %v1549_v12 = vmul.f32 %v1547_v4, %v3031_v8 }
 0x2a3   : > { %v1543_v13 = vsub.f32 %v1541_v7, %v2590_v63  ;;  %v1540_v15 = vsub.f32 %v1529_v11, %v1377_v62 }
 0x2a4   : > { %2598 = vmatprep.subr.mxu1 %v1549_v12  ;;  %v1548_v27 = vmul.f32 %v1546_v9, %v3034_v14 }
 0x2a5   : > { %v1553_v29 = vsub.f32 %v1543_v13, %v2378_v10  ;;  %v1542_v30 = vsub.f32 %v1540_v15, %v1452_v2  ;;  %2599 = vmatpush3.msra.mxu1 %v1549_v12 }
 0x2a6   : > { %2600 = vmatprep.subr.mxu1 %v1548_v27 }
 0x2a7   : > { %v1552_v31 = vsub.f32 %v1542_v30, %v2377_v22  ;;  %2601 = vmatpush3.msra.mxu1 %v1548_v27  ;;  %v1555_v33 = vmul.f32 %v1553_v29, %v3031_v8  ;;  %v473_v8 = vmul.f32 %v2899_v18, %v471_v45  ;;  %v1794_v18 = vld [vmem:[%s3080_s14 + $0x8] sm:$0xff] }
 0x2a8   : > { %2603 = vmatmul.mubr.msk.f32.vlgmr.msra.gmra.mxu1 %vm483_vm0, %v2994_v50  ;;  %v468_v50 = vmul.f32 %v467_v39, %v2893_v17  ;;  %v2387_v17 = vld [vmem:[%s3080_s14 + $0x20] sm:$0xff] }
 0x2a9   : > { %2605 = vmatprep.subr.mxu0 %v1555_v33  ;;  %v1554_v41 = vmul.f32 %v1552_v31, %v3034_v14  ;;  %v1707_v42 = vadd.f32 %v1555_v33, %v1549_v12  ;;  %2616 = vmatprep.mubr.msk.f32.mxu1 %vm483_vm0, %v3048_v44  ;;  %v472_v14 = vmul.f32 %v2910_v19, %v471_v45 }
 0x2aa   : > { %2606 = vmatpush3.msra.mxu0 %v1555_v33  ;;  %v2000_v19 = vadd.f32 %v473_v8, %v469_v43  ;;  %v1995_v63 = vadd.f32 %v2387_v17, %v1793_v16 }
 0x2ab   : > { %2607 = vmatprep.subr.mxu0 %v1554_v41  ;;  %2612 = vmatprep.subr.mxu1 %v1707_v42  ;;  %v1706_v47 = vadd.f32 %v1554_v41, %v1548_v27  ;;  %v1999_v44 = vadd.f32 %v472_v14, %v468_v50 }
 0x2ac   : > { %2608 = vmatpush3.msra.mxu0 %v1554_v41  ;;  %2613 = vmatpush3.msra.mxu1 %v1707_v42 }
 0x2ad   : > { %2610 = vmatmul.mubr.msk.f32.vlgmr.msra.gmra.mxu0 %vm483_vm0, %v3040_v37  ;;  %2614 = vmatprep.subr.mxu1 %v1706_v47  ;;  %v2388_v37 = vld [vmem:[%s3080_s14 + $0x28] sm:$0xff] }
 0x2ae   : > { %2619 = vmatprep.subr.mxu0 %v469_v43  ;;  %2615 = vmatpush3.msra.mxu1 %v1706_v47  ;;  %v1996_v2 = vadd.f32 %v2388_v37, %v1794_v18 }
 0x2af   : > { %2620 = vmatpush3.msra.mxu0 %v469_v43  ;;  %2623 = vmatprep.mubr.msk.f32.mxu0 %vm483_vm0, %v1793_v16 }
 0x2b0   : > { %2617 = vmatmul.mubr.msk.f32.vlgmr.msra.gmra.mxu1 %vm483_vm0, %v3053_v46  ;;  %2621 = vmatprep.subr.mxu0 %v468_v50 }
 0x2b1   : > { %2629 = vmatprep.subr.mxu1 %v473_v8  ;;  %2622 = vmatpush3.msra.mxu0 %v468_v50 }
 0x2b2   : > { %2630 = vmatpush3.msra.mxu1 %v473_v8  ;;  %2633 = vmatprep.mubr.msk.f32.mxu1 %vm483_vm0, %v2387_v17 }
 0x2b3   : > { %2624 = vmatmul.mubr.msk.f32.vlgmr.msra.gmra.mxu0 %vm483_vm0, %v1794_v18  ;;  %2631 = vmatprep.subr.mxu1 %v472_v14 }
 0x2b4   : > { %2632 = vmatpush3.msra.mxu1 %v472_v14  ;;  %2639 = vmatprep.subr.mxu0 %v2000_v19 }
 0x2b5   : > { %2634 = vmatmul.mubr.msk.f32.vlgmr.msra.gmra.mxu1 %vm483_vm0, %v2388_v37  ;;  %2640 = vmatpush3.msra.mxu0 %v2000_v19 }
 0x2b6   : > { %2641 = vmatprep.subr.mxu0 %v1999_v44 }
 0x2b7   : > { %2642 = vmatpush3.msra.mxu0 %v1999_v44 }
 0x368   : > { %v2604_v46 = vpop.f32.mrf.mxu1 }
 0x36a   : > { %v1622_v48 = vpop.f32.mrf.mxu1 }
 0x36d   : > { %v2611_v49 = vpop.f32.mrf.mxu0 }
 0x36e   : > { %v1784_v38 = vsub.f32 %v2604_v46, %v2611_v49 }
 0x36f   : > { %v1697_v51 = vpop.f32.mrf.mxu0 }
 0x370   : > { %1790 = vst.msk [vmem:[%s3080_s14 + $0x18] sm:$0xff] %vm483_vm0, %v1784_v38  ;;  %v1783_v40 = vsub.f32 %v1622_v48, %v1697_v51  ;;  %v2618_v35 = vpop.f32.mrf.mxu1 }
 0x371   : > { %v1786_v52 = vsub.f32 %v2618_v35, %v2604_v46 }
 0x372   : > { %1789 = vst.msk [vmem:[%s3080_s14 + $0x10] sm:$0xff] %vm483_vm0, %v1783_v40  ;;  %v1774_v54 = vpop.f32.mrf.mxu1 }
 0x373   : > { %v1788_v57 = vsub.f32 %v1786_v52, %v2611_v49  ;;  %v1785_v53 = vsub.f32 %v1774_v54, %v1622_v48  ;;  %v2625_v34 = vpop.f32.mrf.mxu0 }
 0x375   : > { %2386 = vst.msk [vmem:[%s3080_s14 + $0x38] sm:$0xff] %vm483_vm0, %v1788_v57  ;;  %v1787_v36 = vsub.f32 %v1785_v53, %v1697_v51  ;;  %v2635_v55 = vpop.f32.mrf.mxu1  ;;  %v1879_v58 = vpop.f32.mrf.mxu0 }
 0x376   : > { %v2099_v56 = vsub.f32 %v2625_v34, %v2635_v55 }
 0x377   : > { %2385 = vst.msk [vmem:[%s3080_s14 + $0x30] sm:$0xff] %vm483_vm0, %v1787_v36  ;;  %v1976_v59 = vpop.f32.mrf.mxu1  ;;  %v1796_v1 = vld [vmem:[%s3080_s14 + $0x18] sm:$0xff] }
 0x378   : > { %v2115_v60 = vsub.f32 %v2925_v24, %v2099_v56  ;;  %v2098_v61 = vsub.f32 %v1879_v58, %v1976_v59 }
 0x379   : > { %v1795_v62 = vld [vmem:[%s3080_s14 + $0x10] sm:$0xff] }
 0x37a   : > { %2119 = vst.msk [vmem:[%s3080_s14 + $0x8] sm:$0xff] %vm483_vm0, %v2115_v60  ;;  %v2114_v0 = vsub.f32 %v2915_v20, %v2098_v61  ;;  %2626 = vmatprep.mubr.msk.f32.mxu0 %vm483_vm0, %v1795_v62 }
 0x37b   : > { %2627 = vmatmul.mubr.msk.f32.gmra.mxu0 %vm483_vm0, %v1796_v1 }
 0x37c   : > { %2118 = vst.msk [vmem:[%s3080_s14] sm:$0xff] %vm483_vm0, %v2114_v0  ;;  %2643 = vmatprep.mubr.msk.f32.mxu0 %vm483_vm0, %v1995_v63  ;;  %v2390_v4 = vld [vmem:[%s3080_s14 + $0x38] sm:$0xff] }
 0x37d   : > { %v1998_v20 = vadd.f32 %v2390_v4, %v1796_v1 }
 0x37e   : > { %v2389_v3 = vld [vmem:[%s3080_s14 + $0x30] sm:$0xff] }
 0x37f   : > { %2636 = vmatprep.mubr.msk.f32.mxu1 %vm483_vm0, %v2389_v3  ;;  %v1997_v24 = vadd.f32 %v2389_v3, %v1795_v62  ;;  %2644 = vmatmul.mubr.msk.f32.vlgmr.msra.gmra.mxu0 %vm483_vm0, %v1996_v2 }
 0x380   : > { %2637 = vmatmul.mubr.msk.f32.gmra.mxu1 %vm483_vm0, %v2390_v4 }
 0x381   : > { %2646 = vmatprep.mubr.msk.f32.mxu0 %vm483_vm0, %v1997_v24 }
 0x383   : > { %2647 = vmatmul.mubr.msk.f32.gmra.mxu0 %vm483_vm0, %v1998_v20 }
 0x43b   : > { %v2628_v5 = vpop.f32.mrf.mxu0 }
 0x43d   : > { %v1889_v6 = vpop.f32.mrf.mxu0 }
 0x43f   : > { %v2645_v7 = vpop.f32.mrf.mxu0 }
 0x440   : > { %v2638_v9 = vpop.f32.mrf.mxu1  ;;  %v2103_v10 = vsub.f32 %v2645_v7, %v2625_v34 }
 0x441   : > { %v2101_v11 = vsub.f32 %v2628_v5, %v2638_v9  ;;  %v2079_v12 = vpop.f32.mrf.mxu0 }
 0x442   : > { %v2107_v13 = vsub.f32 %v2103_v10, %v2635_v55  ;;  %v1986_v15 = vpop.f32.mrf.mxu1  ;;  %v2102_v22 = vsub.f32 %v2079_v12, %v1879_v58 }
 0x443   : > { %v2117_v27 = vsub.f32 %v2933_v26, %v2101_v11  ;;  %v2100_v29 = vsub.f32 %v1889_v6, %v1986_v15  ;;  %v2648_v30 = vpop.f32.mrf.mxu0 }
 0x444   : > { %v2127_v31 = vsub.f32 %v2931_v25, %v2107_v13  ;;  %v2106_v33 = vsub.f32 %v2102_v22, %v1976_v59  ;;  %v2105_v39 = vsub.f32 %v2648_v30, %v2628_v5 }
 0x445   : > { %2121 = vst.msk [vmem:[%s3080_s14 + $0x18] sm:$0xff] %vm483_vm0, %v2117_v27  ;;  %v2116_v41 = vsub.f32 %v2917_v21, %v2100_v29  ;;  %v2089_v42 = vpop.f32.mrf.mxu0  ;;  %v2188_v21 = vld [vmem:[%s3080_s14] sm:$0xff] (%p2857_p6) }
 0x446   : > { %2408 = vst.msk [vmem:[%s3080_s14 + $0x28] sm:$0xff] %vm483_vm0, %v2127_v31  ;;  %v2126_v43 = vsub.f32 %v2923_v23, %v2106_v33  ;;  %v2109_v45 = vsub.f32 %v2105_v39, %v2638_v9  ;;  %v2104_v47 = vsub.f32 %v2089_v42, %v1889_v6  ;;  %v2190_v23 = vld [vmem:[%s3080_s14 + $0x8] sm:$0xff] (%p2857_p6)  ;;  %2189 = vst [vmem:[%s2145_s19] sm:$0xff] (%p2857_p6), %v2188_v21 }
 0x447   : > { %2120 = vst.msk [vmem:[%s3080_s14 + $0x10] sm:$0xff] %vm483_vm0, %v2116_v41  ;;  %2191 = vst [vmem:[%s2145_s19 + $0x8] sm:$0xff] (%p2857_p6), %v2190_v23 }
 0x448   : > { %2407 = vst.msk [vmem:[%s3080_s14 + $0x20] sm:$0xff] %vm483_vm0, %v2126_v43  ;;  %v2129_v25 = vsub.f32 %v2952_v32, %v2109_v45  ;;  %v2108_v26 = vsub.f32 %v2104_v47, %v1986_v15  ;;  %2140 = sbr.rel (!%p2857_p6) target bundleno = 1109 (0x455), region = 124 }
 0x44a   : > { %2410 = vst.msk [vmem:[%s3080_s14 + $0x38] sm:$0xff] %vm483_vm0, %v2129_v25  ;;  %v2128_v50 = vsub.f32 %v2937_v28, %v2108_v26 }
 0x44c   : > { %2409 = vst.msk [vmem:[%s3080_s14 + $0x30] sm:$0xff] %vm483_vm0, %v2128_v50  ;;  %v2194_v28 = vld [vmem:[%s3080_s14 + $0x18] sm:$0xff] (%p2857_p6) }
 0x44d   : > { %v2198_v16 = vld [vmem:[%s3080_s14 + $0x28] sm:$0xff]  ;;  %2195 = vst [vmem:[%s2145_s19 + $0x18] sm:$0xff] %v2194_v28 }
 0x44e   : > { %v2192_v32 = vld [vmem:[%s3080_s14 + $0x10] sm:$0xff]  ;;  %2199 = vst [vmem:[%s2145_s19 + $0x88] sm:$0xff] %v2198_v16 }
 0x44f   : > { %v2196_v8 = vld [vmem:[%s3080_s14 + $0x20] sm:$0xff]  ;;  %2193 = vst [vmem:[%s2145_s19 + $0x10] sm:$0xff] %v2192_v32 }
 0x450   : > { %2197 = vst [vmem:[%s2145_s19 + $0x80] sm:$0xff] %v2196_v8 }
 0x451   : > { %v2202_v17 = vld [vmem:[%s3080_s14 + $0x38] sm:$0xff] }
 0x452   : > { %2203 = vst [vmem:[%s2145_s19 + $0x98] sm:$0xff] %v2202_v17 }
 0x453   : > { %v2200_v14 = vld [vmem:[%s3080_s14 + $0x30] sm:$0xff] }
 0x454   : > { %2201 = vst [vmem:[%s2145_s19 + $0x90] sm:$0xff] %v2200_v14 }
 0x455 PF: > { %s17_s29 = sadd.s32 1, %s2763_s29   ;;  %s3211_s23 = smov %s2743_s24 }
 0x456   : > { %p14_p13 = scmp.ge.s32.totalorder %s17_s29, 6   ;;  %s3212_s24 = smov %s2866_s16 }
 0x457   : > { %s3213_s25 = smov %s2755_s27  ;;  %s3214_s26 = smov %s2759_s28 }
 0x458   : > { %s3215_s27 = smov %s3218_s0  ;;  %s3216_s28 = smov %s3222_s30 }
 0x459   :  { %16 = sbr.rel (!%p14_p13) target bundleno = 6 (0x6), region = 209 }

// kernel: _forward_impl.1
= control target key start
LH: loop header
LB: loop body
LE: loop exit
PB: predicated region body
PF: predicated region fallthrough
CT: control target
= control target key end

     0   :  { %s3202_s0 = inlined_call_operand.<no memory space> [shape: f32[1], index: 0, kind: input, shape index: {}]   ;;  %s3203_s1 = inlined_call_operand.vmem [shape: f32[2,128,16], index: 1, kind: input, shape index: {}]   ;;  %s3204_s2 = inlined_call_operand.vmem [shape: f32[2,128,16], index: 2, kind: input, shape index: {}]   ;;  %s3205_s3 = inlined_call_operand.vmem [shape: f32[2,16,16], index: 3, kind: input, shape index: {}]   ;;  %s3206_s4 = inlined_call_operand.vmem [shape: f32[2,16,16], index: 4, kind: input, shape index: {}, may-alias: {4,5}]   ;;  %s3207_s5 = inlined_call_operand.vmem [shape: f32[2,16,16], index: 5, kind: input, shape index: {}, may-alias: {4,5}]   ;;  %s3208_s6 = inlined_call_operand.vmem [shape: f32[2,128,16], index: 6, kind: output, shape index: {}]  }
   0x1   :  { %11 = sst [smem:[#allocation2]] %s3202_s0 }
   0x2   :  { %s2803_s23 = smov 0   ;;  %s2805_s24 = smov 0  }
   0x3   :  { %s2807_s25 = smov 0   ;;  %s2809_s26 = smov 0  }
   0x4   :  { %s2811_s27 = smov 0   ;;  %s2813_s28 = smov 0  }
   0x5   :  { %s2815_s29 = smov 0  }
   0x6 LB: > { %s26_s0 = sadd.s32 1, %s2755_s27  ;;  %s29_s30 = sadd.s32 1, %s2759_s28  ;;  %s2763_s29 = sphi %s2815_s29, %s17_s29   ;;  %s2759_s28 = sphi %s2813_s28, %s3216_s28   ;;  %s2755_s27 = sphi %s2811_s27, %s3215_s27   ;;  %s2751_s26 = sphi %s2809_s26, %s3214_s26   ;;  %s2747_s25 = sphi %s2807_s25, %s3213_s25   ;;  %s2743_s24 = sphi %s2805_s24, %s3212_s24   ;;  %s2739_s23 = sphi %s2803_s23, %s3211_s23  }
   0x7   : > { %p27_p0 = scmp.ge.s32.totalorder %s26_s0, 2  ;;  %s2311_s7 = sadd.s32 4294967295, %s2763_s29  }
   0x8   : > { %s2313_s8 = sshll.u32 %s2759_s28, 1  ;;  %p68_p1 = scmp.ne.s32.totalorder %s2743_s24, %s2739_s23 }
   0x9   : > { %s3218_s0 = smov (%p27_p0, %s26_s0), 0  ;;  %s3220_s30 = smov (!%p27_p0, %s29_s30), %s2759_s28 }
   0xa   : > { %p31_p2 = scmp.ge.s32.totalorder %s3220_s30, 2  ;;  %p69_p3 = scmp.eq.s32.totalorder %s2763_s29, 0 }
   0xb   : > { %s2849_s9 = sadd.s32 %s2755_s27, %s2313_s8  ;;  %p200_p4 = scmp.eq.s32.totalorder %s2311_s7, 3 }
   0xc   : > { %s3222_s30 = smov (%p31_p2, %s3220_s30), 0  ;;  %p2853_p5 = por %p69_p3, %p68_p1 }
   0xd   : > { %p2857_p6 = por %p200_p4, %p68_p1  ;;  %s2314_s12 = sshll.u32 %s3222_s30, 1 }
   0xe   : > { %s57_s13 = sadd.s32 %s2314_s12, %s3218_s0  ;;  %s61_s15 = sadd.s32 1, %s2743_s24 }
   0xf   : > { %s58_s14 = ssub.s32 %s2849_s9, %s57_s13  ;;  %p2320_p8 = scmp.ge.s32.totalorder %s2763_s29, 4 }
  0x10   : > { %p59_p7 = scmp.eq.s32.totalorder %s58_s14, 0 }
  0x11   : > { %231 = sbr.rel (%p2320_p8) target bundleno = 38 (0x26), region = 28 }
  0x12   : > { %s2866_s16 = scalar_select %p59_p7, %s2743_s24, %s61_s15  }
  0x16   : > { %234 = sbr.rel (!%p2853_p5) target bundleno = 30 (0x1e), region = 32  ;;  %s236_s17 = sand.u32 (%p2853_p5), 1, %s2743_s24  }
  0x17   : > { %s2417_s18 = sshll.u32 (%p2853_p5), %s2849_s9, 5  ;;  %s2321_s19 = sshll.u32 (%p2853_p5), %s236_s17, 6 }
  0x18   : > { %s243_s22 = scalar_lea.vmem (%p2853_p5), %s3203_s1, %s2417_s18  ;;  %s238_s7 = scalar_lea.vmem (%p2853_p5), [#allocation3], %s2321_s19 }
  0x19   : > { %v286_v0 = vld [vmem:[%s243_s22] sm:$0xff] (%p2853_p5)  ;;  %v288_v1 = vld [vmem:[%s243_s22 + $0x8] sm:$0xff] (%p2853_p5)  ;;  %v290_v2 = vld [vmem:[%s243_s22 + $0x10] sm:$0xff] (%p2853_p5) }
  0x1a   : > { %287 = vst [vmem:[%s238_s7] sm:$0xff] (%p2853_p5), %v286_v0  ;;  %289 = vst [vmem:[%s238_s7 + $0x8] sm:$0xff] (%p2853_p5), %v288_v1  ;;  %v292_v3 = vld [vmem:[%s243_s22 + $0x18] sm:$0xff] (%p2853_p5)  ;;  %v294_v4 = vld [vmem:[%s243_s22 + $0x80] sm:$0xff] (%p2853_p5) }
  0x1b   : > { %291 = vst [vmem:[%s238_s7 + $0x10] sm:$0xff] %v290_v2  ;;  %v296_v5 = vld [vmem:[%s243_s22 + $0x88] sm:$0xff]  ;;  %293 = vst [vmem:[%s238_s7 + $0x18] sm:$0xff] %v292_v3  ;;  %v298_v6 = vld [vmem:[%s243_s22 + $0x90] sm:$0xff] }
  0x1c   : > { %295 = vst [vmem:[%s238_s7 + $0x20] sm:$0xff] %v294_v4  ;;  %297 = vst [vmem:[%s238_s7 + $0x28] sm:$0xff] %v296_v5  ;;  %v300_v7 = vld [vmem:[%s243_s22 + $0x98] sm:$0xff] }
  0x1d   : > { %299 = vst [vmem:[%s238_s7 + $0x30] sm:$0xff] %v298_v6  ;;  %301 = vst [vmem:[%s238_s7 + $0x38] sm:$0xff] %v300_v7 }
  0x1e PF: > { %307 = sbr.rel (!%p2853_p5) target bundleno = 38 (0x26), region = 70  ;;  %s309_s8 = sand.u32 (%p2853_p5), 1, %s2743_s24  }
  0x1f   : > { %s2418_s12 = sshll.u32 (%p2853_p5), %s2849_s9, 5  ;;  %s2325_s13 = sshll.u32 (%p2853_p5), %s309_s8, 6 }
  0x20   : > { %s316_s17 = scalar_lea.vmem (%p2853_p5), %s3204_s2, %s2418_s12  ;;  %s311_s18 = scalar_lea.vmem (%p2853_p5), [#allocation4], %s2325_s13 }
  0x21   : > { %v359_v8 = vld [vmem:[%s316_s17] sm:$0xff] (%p2853_p5)  ;;  %v361_v9 = vld [vmem:[%s316_s17 + $0x8] sm:$0xff] (%p2853_p5)  ;;  %v363_v10 = vld [vmem:[%s316_s17 + $0x10] sm:$0xff] (%p2853_p5) }
  0x22   : > { %360 = vst [vmem:[%s311_s18] sm:$0xff] (%p2853_p5), %v359_v8  ;;  %362 = vst [vmem:[%s311_s18 + $0x8] sm:$0xff] (%p2853_p5), %v361_v9  ;;  %v365_v11 = vld [vmem:[%s316_s17 + $0x18] sm:$0xff] (%p2853_p5)  ;;  %v367_v12 = vld [vmem:[%s316_s17 + $0x80] sm:$0xff] (%p2853_p5) }
  0x23   : > { %364 = vst [vmem:[%s311_s18 + $0x10] sm:$0xff] %v363_v10  ;;  %v369_v13 = vld [vmem:[%s316_s17 + $0x88] sm:$0xff]  ;;  %366 = vst [vmem:[%s311_s18 + $0x18] sm:$0xff] %v365_v11  ;;  %v371_v14 = vld [vmem:[%s316_s17 + $0x90] sm:$0xff] }
  0x24   : > { %368 = vst [vmem:[%s311_s18 + $0x20] sm:$0xff] %v367_v12  ;;  %370 = vst [vmem:[%s311_s18 + $0x28] sm:$0xff] %v369_v13  ;;  %v373_v15 = vld [vmem:[%s316_s17 + $0x98] sm:$0xff] }
  0x25   : > { %372 = vst [vmem:[%s311_s18 + $0x30] sm:$0xff] %v371_v14  ;;  %374 = vst [vmem:[%s311_s18 + $0x38] sm:$0xff] %v373_v15 }
  0x26 PF: > { %p2329_p9 = scmp.ge.s32.totalorder %s2763_s29, 1  ;;  %p387_p10 = scmp.lt.s32.totalorder %s2763_s29, 5 }
  0x28   : > { %p388_p11 = pnand %p2329_p9, %p387_p10 }
  0x29   : > { %s394_s21 = sand.u32 (!%p388_p11), 1, %s2739_s23   ;;  %p444_p12 = scmp.lt.s32.totalorder (!%p388_p11), %s2751_s26, 1 }
  0x2a   : > { %391 = sbr.rel (%p388_p11) target bundleno = 1109 (0x455), region = 112  ;;  %s2903_s8 = sshll.u32 (!%p388_p11), %s394_s21, 6 }
  0x2b   : > { %s396_s23 = scalar_lea.vmem (!%p388_p11), [#allocation3], %s2903_s8  ;;  %s3080_s14 = scalar_lea.vmem (!%p388_p11), [#allocation5], %s2903_s8 }
  0x2f   : > { %v2888_v16 = vld [vmem:[%s3207_s5 + $0x8] sm:$0xff]  ;;  %v2893_v17 = vld [vmem:[%s3207_s5] sm:$0xff]  ;;  %v2899_v18 = vld [vmem:[%s3207_s5 + $0x18] sm:$0xff]  ;;  %vm483_vm0 = vcmask 130048   ;;  %s445_s21 = scalar_select %p444_p12, %s2751_s26, 1 }
  0x30   : > { %2505 = vmatprep.subr.mxu0 %v2888_v16  ;;  %2649 = vmatprep.subr.mxu1 %v2888_v16  ;;  %v2910_v19 = vld [vmem:[%s3207_s5 + $0x10] sm:$0xff]  ;;  %v2915_v20 = vld [vmem:[%s396_s23] sm:$0xff]  ;;  %v683_v22 = vadd.f32 %v2899_v18, %v2888_v16  ;;  %v2925_v24 = vld [vmem:[%s396_s23 + $0x8] sm:$0xff]  ;;  %s2412_s17 = sshll.u32 (%p2857_p6), %s2751_s26, 1 }
  0x31   : > { %2506 = vmatpush3.msra.mxu0 %v2888_v16  ;;  %2651 = vmatpush3.msra.mxu1 %v2888_v16  ;;  %v2917_v21 = vld [vmem:[%s396_s23 + $0x10] sm:$0xff]  ;;  %v2923_v23 = vld [vmem:[%s396_s23 + $0x20] sm:$0xff]  ;;  %v2931_v25 = vld [vmem:[%s396_s23 + $0x28] sm:$0xff]  ;;  %v682_v27 = vadd.f32 %v2910_v19, %v2893_v17  ;;  %s2419_s22 = sshll.u32 %s445_s21, 4  ;;  %s2142_s18 = sadd.s32 (%p2857_p6), %s2747_s25, %s2412_s17 }
  0x32   : > { %2507 = vmatprep.subr.mxu0 %v2893_v17  ;;  %2650 = vmatprep.subr.mxu1 %v2893_v17  ;;  %v2933_v26 = vld [vmem:[%s396_s23 + $0x18] sm:$0xff]  ;;  %v2937_v28 = vld [vmem:[%s396_s23 + $0x30] sm:$0xff]  ;;  %v678_v29 = vadd.f32 %v2923_v23, %v2915_v20  ;;  %v679_v30 = vadd.f32 %v2931_v25, %v2925_v24  ;;  %v2972_v34 = vld [vmem:[%s3206_s4] sm:$0xff]  ;;  %s448_s13 = scalar_lea.vmem %s3205_s3, %s2419_s22  ;;  %s2420_s11 = sshll.u32 (%p2857_p6), %s2142_s18, 5 }
  0x33   : > { %2508 = vmatpush3.msra.mxu0 %v2893_v17  ;;  %2652 = vmatpush3.msra.mxu1 %v2893_v17  ;;  %v680_v31 = vadd.f32 %v2937_v28, %v2917_v21  ;;  %v2952_v32 = vld [vmem:[%s396_s23 + $0x38] sm:$0xff]  ;;  %v2979_v35 = vld [vmem:[%s3206_s4 + $0x10] sm:$0xff]  ;;  %v2994_v50 = vld [vmem:[%s3206_s4 + $0x8] sm:$0xff]  ;;  %s3026_s23 = scalar_lea.vmem [#allocation4], %s2903_s8  ;;  %s3091_s8 = sld [smem:[#allocation2]] }
  0x34   : > { %2509 = vmatprep.mubr.msk.f32.mxu0 %vm483_vm0, %v2915_v20  ;;  %2512 = vmatprep.mubr.msk.f32.mxu1 %vm483_vm0, %v2917_v21  ;;  %v681_v33 = vadd.f32 %v2952_v32, %v2933_v26  ;;  %v2983_v36 = vadd.f32 %v2979_v35, %v2972_v34  ;;  %v2999_v53 = vld [vmem:[%s3206_s4 + $0x18] sm:$0xff]  ;;  %v3016_v56 = vsub.f32 0.0, %v2979_v35  ;;  %v1047_v0 = vld [vmem:[%s3026_s23 + $0x8] sm:$0xff]  ;;  %v1046_v6 = vld [vmem:[%s3026_s23] sm:$0xff]  ;;  %s2145_s19 = scalar_lea.vmem (%p2857_p6), %s3208_s6, %s2420_s11 }
  0x35   : > { %2510 = vmatmul.mubr.msk.f32.vlgmr.msra.gmra.mxu0 %vm483_vm0, %v2925_v24  ;;  %2513 = vmatmul.mubr.msk.f32.vlgmr.msra.gmra.mxu1 %vm483_vm0, %v2933_v26  ;;  %v3005_v55 = vadd.f32 %v2999_v53, %v2994_v50  ;;  %v2362_v4 = vld [vmem:[%s3026_s23 + $0x28] sm:$0xff]  ;;  %v2361_v13 = vld [vmem:[%s3026_s23 + $0x20] sm:$0xff] }
  0x36   : > { %2515 = vmatprep.subr.mxu1 %v2899_v18  ;;  %2525 = vmatprep.subr.mxu0 %v683_v22  ;;  %v3031_v8 = vld [vmem:[%s448_s13 + $0x8] sm:$0xff]  ;;  %v3034_v14 = vld [vmem:[%s448_s13] sm:$0xff] }
  0x37   : > { %2516 = vmatpush3.msra.mxu1 %v2899_v18  ;;  %2526 = vmatpush3.msra.mxu0 %v683_v22 }
  0x38   : > { %2517 = vmatprep.subr.mxu1 %v2910_v19  ;;  %2527 = vmatprep.subr.mxu0 %v682_v27 }
  0x39   : > { %2518 = vmatpush3.msra.mxu1 %v2910_v19  ;;  %2519 = vmatprep.mubr.msk.f32.mxu1 %vm483_vm0, %v2923_v23  ;;  %s470_s15 = ssub.f32 0.0, %s3091_s8 }
  0x3a   : > { %2528 = vmatpush3.msra.mxu0 %v682_v27  ;;  %2529 = vmatprep.mubr.msk.f32.mxu0 %vm483_vm0, %v678_v29 }
  0x3b   : > { %2520 = vmatmul.mubr.msk.f32.vlgmr.msra.gmra.mxu1 %vm483_vm0, %v2931_v25  ;;  %2530 = vmatmul.mubr.msk.f32.vlgmr.msra.gmra.mxu0 %vm483_vm0, %v679_v30 }
  0x3c   : > { %2522 = vmatprep.mubr.msk.f32.mxu1 %vm483_vm0, %v2937_v28  ;;  %2532 = vmatprep.mubr.msk.f32.mxu0 %vm483_vm0, %v680_v31 }
  0x3f   : > { %2523 = vmatmul.mubr.msk.f32.gmra.mxu1 %vm483_vm0, %v2952_v32  ;;  %2533 = vmatmul.mubr.msk.f32.gmra.mxu0 %vm483_vm0, %v681_v33 }
  0x40   : > { %2539 = vmatprep.mubr.msk.f32.mxu1 %vm483_vm0, %v2972_v34  ;;  %2553 = vmatprep.mubr.msk.f32.mxu0 %vm483_vm0, %v2983_v36 }
  0xf5   : > { %v2511_v37 = vpop.f32.mrf.mxu0  ;;  %v2987_v38 = vpop.f32.mrf.mxu1 }
  0xf7   : > { %v562_v39 = vpop.f32.mrf.mxu0  ;;  %v2989_v40 = vpop.f32.mrf.mxu1 }
  0xfb   : > { %v2521_v41 = vpop.f32.mrf.mxu1  ;;  %v2531_v42 = vpop.f32.mrf.mxu0 }
  0xfc   : > { %v782_v43 = vsub.f32 %v2511_v37, %v2521_v41  ;;  %v786_v44 = vsub.f32 %v2531_v42, %v2511_v37  ;;  %v3040_v37 = vsub.f32 0.0, %v2999_v53 }
  0xfd   : > { %v659_v45 = vpop.f32.mrf.mxu1  ;;  %v762_v46 = vpop.f32.mrf.mxu0 }
  0xfe   : > { %v790_v47 = vsub.f32 %v786_v44, %v2521_v41  ;;  %v781_v48 = vsub.f32 %v562_v39, %v659_v45  ;;  %v785_v49 = vsub.f32 %v762_v46, %v562_v39  ;;  %2535 = vmatprep.subr.mxu1 %v782_v43  ;;  %v3048_v44 = vadd.f32 %v3016_v56, %v2972_v34 }
  0xff   : > { %2536 = vmatpush3.msra.mxu1 %v782_v43  ;;  %v2524_v57 = vpop.f32.mrf.mxu1  ;;  %v2534_v59 = vpop.f32.mrf.mxu0  ;;  %v3053_v46 = vadd.f32 %v3040_v37, %v2994_v50 }
 0x100   : > { %v789_v51 = vsub.f32 %v785_v49, %v659_v45  ;;  %2537 = vmatprep.subr.mxu1 %v781_v48  ;;  %v958_v52 = vadd.f32 %v790_v47, %v782_v43  ;;  %v788_v42 = vsub.f32 %v2534_v59, %v2987_v38  ;;  %v784_v45 = vsub.f32 %v2987_v38, %v2524_v57 }
 0x101   : > { %2538 = vmatpush3.msra.mxu1 %v781_v48  ;;  %v669_v58 = vpop.f32.mrf.mxu1  ;;  %v772_v62 = vpop.f32.mrf.mxu0 }
 0x102   : > { %2540 = vmatmul.mubr.msk.f32.vlgmr.msra.gmra.mxu1 %vm483_vm0, %v2994_v50  ;;  %2542 = vmatprep.subr.mxu1 %v790_v47  ;;  %v957_v54 = vadd.f32 %v789_v51, %v781_v48  ;;  %v792_v48 = vsub.f32 %v788_v42, %v2524_v57  ;;  %v783_v49 = vsub.f32 %v2989_v40, %v669_v58 }
 0x103   : > { %2549 = vmatprep.subr.mxu0 %v958_v52  ;;  %2543 = vmatpush3.msra.mxu1 %v790_v47  ;;  %v787_v47 = vsub.f32 %v772_v62, %v2989_v40 }
 0x104   : > { %2550 = vmatpush3.msra.mxu0 %v958_v52  ;;  %2544 = vmatprep.subr.mxu1 %v789_v51 }
 0x105   : > { %2551 = vmatprep.subr.mxu0 %v957_v54  ;;  %2545 = vmatpush3.msra.mxu1 %v789_v51  ;;  %v791_v38 = vsub.f32 %v787_v47, %v669_v58  ;;  %v1462_v51 = vadd.f32 %v792_v48, %v784_v45 }
 0x106   : > { %2546 = vmatprep.mubr.msk.f32.mxu1 %vm483_vm0, %v2979_v35  ;;  %2552 = vmatpush3.msra.mxu0 %v957_v54 }
 0x107   : > { %2547 = vmatmul.mubr.msk.f32.vlgmr.msra.gmra.mxu1 %vm483_vm0, %v2999_v53  ;;  %2554 = vmatmul.mubr.msk.f32.vlgmr.msra.gmra.mxu0 %vm483_vm0, %v3005_v55  ;;  %v1461_v40 = vadd.f32 %v791_v38, %v783_v49 }
 0x108   : > { %2560 = vmatprep.mubr.msk.f32.mxu1 %vm483_vm0, %v2972_v34  ;;  %2567 = vmatprep.mubr.msk.f32.mxu0 %vm483_vm0, %v3016_v56 }
 0x1c2   : > { %v2541_v60 = vpop.f32.mrf.mxu1 }
 0x1c4   : > { %v865_v61 = vpop.f32.mrf.mxu1 }
 0x1c7   : > { %v2548_v63 = vpop.f32.mrf.mxu1  ;;  %v2555_v1 = vpop.f32.mrf.mxu0 }
 0x1c8   : > { %v1041_v2 = vsub.f32 %v2541_v60, %v2548_v63  ;;  %v1043_v3 = vsub.f32 %v2555_v1, %v2541_v60 }
 0x1c9   : > { %v946_v5 = vpop.f32.mrf.mxu1  ;;  %v1031_v7 = vpop.f32.mrf.mxu0 }
 0x1ca   : > { %v1049_v9 = vsub.f32 %v1041_v2, %v1047_v0  ;;  %v1045_v10 = vsub.f32 %v1043_v3, %v2548_v63  ;;  %v1040_v11 = vsub.f32 %v865_v61, %v946_v5  ;;  %v1042_v12 = vsub.f32 %v1031_v7, %v865_v61  ;;  %v1545_v0 = vld [vmem:[%s3026_s23 + $0x18] sm:$0xff]  ;;  %v1544_v3 = vld [vmem:[%s3026_s23 + $0x10] sm:$0xff] }
 0x1cc   : > { %v1056_v15 = vsub.f32 %v1045_v10, %v2362_v4  ;;  %v1048_v22 = vsub.f32 %v1040_v11, %v1046_v6  ;;  %v1044_v27 = vsub.f32 %v1042_v12, %v946_v5  ;;  %v1051_v29 = vmul.f32 %v1049_v9, %v3031_v8  ;;  %v2378_v10 = vld [vmem:[%s3026_s23 + $0x38] sm:$0xff] }
 0x1ce   : > { %v1055_v30 = vsub.f32 %v1044_v27, %v2361_v13  ;;  %2556 = vmatprep.subr.mxu1 %v1051_v29  ;;  %v1050_v31 = vmul.f32 %v1048_v22, %v3034_v14  ;;  %v1058_v33 = vmul.f32 %v1056_v15, %v3031_v8  ;;  %v2377_v22 = vld [vmem:[%s3026_s23 + $0x30] sm:$0xff] }
 0x1cf   : > { %2557 = vmatpush3.msra.mxu1 %v1051_v29 }
 0x1d0   : > { %2558 = vmatprep.subr.mxu1 %v1050_v31  ;;  %2563 = vmatprep.subr.mxu0 %v1058_v33  ;;  %v1057_v39 = vmul.f32 %v1055_v30, %v3034_v14  ;;  %v1218_v41 = vadd.f32 %v1058_v33, %v1051_v29 }
 0x1d1   : > { %2559 = vmatpush3.msra.mxu1 %v1050_v31  ;;  %2564 = vmatpush3.msra.mxu0 %v1058_v33 }
 0x1d2   : > { %2561 = vmatmul.mubr.msk.f32.vlgmr.msra.gmra.mxu1 %vm483_vm0, %v2994_v50  ;;  %2565 = vmatprep.subr.mxu0 %v1057_v39  ;;  %v1217_v43 = vadd.f32 %v1057_v39, %v1050_v31 }
 0x1d3   : > { %2570 = vmatprep.subr.mxu1 %v1218_v41  ;;  %2566 = vmatpush3.msra.mxu0 %v1057_v39  ;;  %v467_v39 = vstv %s3091_s8 }
 0x1d4   : > { %2571 = vmatpush3.msra.mxu1 %v1218_v41  ;;  %2568 = vmatmul.mubr.msk.f32.vlgmr.msra.gmra.mxu0 %vm483_vm0, %v3040_v37 }
 0x1d5   : > { %2572 = vmatprep.subr.mxu1 %v1217_v43  ;;  %2577 = vmatprep.subr.mxu0 %v784_v45 }
 0x1d6   : > { %2573 = vmatpush3.msra.mxu1 %v1217_v43  ;;  %2574 = vmatprep.mubr.msk.f32.mxu1 %vm483_vm0, %v3048_v44  ;;  %v469_v43 = vmul.f32 %v467_v39, %v2888_v16 }
 0x1d7   : > { %2578 = vmatpush3.msra.mxu0 %v784_v45  ;;  %2575 = vmatmul.mubr.msk.f32.vlgmr.msra.gmra.mxu1 %vm483_vm0, %v3053_v46  ;;  %v471_v45 = vstv %s470_s15 }
 0x1d8   : > { %2579 = vmatprep.subr.mxu0 %v783_v49  ;;  %2584 = vmatprep.subr.mxu1 %v792_v48 }
 0x1d9   : > { %2580 = vmatpush3.msra.mxu0 %v783_v49  ;;  %2581 = vmatprep.mubr.msk.f32.mxu0 %vm483_vm0, %v2972_v34 }
 0x1da   : > { %2585 = vmatpush3.msra.mxu1 %v792_v48  ;;  %2582 = vmatmul.mubr.msk.f32.vlgmr.msra.gmra.mxu0 %vm483_vm0, %v2994_v50 }
 0x1db   : > { %2586 = vmatprep.subr.mxu1 %v791_v38  ;;  %2591 = vmatprep.subr.mxu0 %v1462_v51 }
 0x1dc   : > { %2587 = vmatpush3.msra.mxu1 %v791_v38  ;;  %2588 = vmatprep.mubr.msk.f32.mxu1 %vm483_vm0, %v2979_v35 }
 0x1dd   : > { %2592 = vmatpush3.msra.mxu0 %v1462_v51  ;;  %2589 = vmatmul.mubr.msk.f32.vlgmr.msra.gmra.mxu1 %vm483_vm0, %v2999_v53 }
 0x1de   : > { %2593 = vmatprep.subr.mxu0 %v1461_v40  ;;  %2595 = vmatprep.mubr.msk.f32.mxu0 %vm483_vm0, %v2983_v36 }
 0x1df   : > { %2594 = vmatpush3.msra.mxu0 %v1461_v40  ;;  %2602 = vmatprep.mubr.msk.f32.mxu1 %vm483_vm0, %v2972_v34 }
 0x1e0   : > { %2596 = vmatmul.mubr.msk.f32.vlgmr.msra.gmra.mxu0 %vm483_vm0, %v3005_v55 }
 0x1e1   : > { %2609 = vmatprep.mubr.msk.f32.mxu0 %vm483_vm0, %v3016_v56 }
 0x292   : > { %v2562_v35 = vpop.f32.mrf.mxu1 }
 0x294   : > { %v1125_v52 = vpop.f32.mrf.mxu1  ;;  %v2569_v54 = vpop.f32.mrf.mxu0 }
 0x295   : > { %v1301_v57 = vsub.f32 %v2562_v35, %v2569_v54 }
 0x296   : > { %v1206_v53 = vpop.f32.mrf.mxu0 }
 0x297   : > { %1307 = vst.msk [vmem:[%s3080_s14 + $0x8] sm:$0xff] %vm483_vm0, %v1301_v57  ;;  %v1300_v34 = vsub.f32 %v1125_v52, %v1206_v53  ;;  %v2576_v36 = vpop.f32.mrf.mxu1 }
 0x298   : > { %v1303_v55 = vsub.f32 %v2576_v36, %v2562_v35 }
 0x299   : > { %1306 = vst.msk [vmem:[%s3080_s14] sm:$0xff] %vm483_vm0, %v1300_v34  ;;  %v1291_v56 = vpop.f32.mrf.mxu1 }
 0x29a   : > { %v1305_v58 = vsub.f32 %v1303_v55, %v2569_v54  ;;  %v1302_v59 = vsub.f32 %v1291_v56, %v1125_v52  ;;  %v2583_v60 = vpop.f32.mrf.mxu0 }
 0x29c   : > { %2370 = vst.msk [vmem:[%s3080_s14 + $0x28] sm:$0xff] %vm483_vm0, %v1305_v58  ;;  %v1304_v61 = vsub.f32 %v1302_v59, %v1206_v53  ;;  %v1377_v62 = vpop.f32.mrf.mxu0 }
 0x29d   : > { %v2590_v63 = vpop.f32.mrf.mxu1 }
 0x29e   : > { %2369 = vst.msk [vmem:[%s3080_s14 + $0x20] sm:$0xff] %vm483_vm0, %v1304_v61  ;;  %v1539_v1 = vsub.f32 %v2583_v60, %v2590_v63 }
 0x29f   : > { %v1452_v2 = vpop.f32.mrf.mxu1 }
 0x2a0   : > { %v1547_v4 = vsub.f32 %v1539_v1, %v1545_v0  ;;  %v1538_v5 = vsub.f32 %v1377_v62, %v1452_v2  ;;  %v2597_v6 = vpop.f32.mrf.mxu0  ;;  %v1793_v16 = vld [vmem:[%s3080_s14] sm:$0xff] }
 0x2a1   : > { %v1541_v7 = vsub.f32 %v2597_v6, %v2583_v60 }
 0x2a2   : > { %v1546_v9 = vsub.f32 %v1538_v5, %v1544_v3  ;;  %v1529_v11 = vpop.f32.mrf.mxu0  ;;  %v1549_v12 = vmul.f32 %v1547_v4, %v3031_v8 }
 0x2a3   : > { %v1543_v13 = vsub.f32 %v1541_v7, %v2590_v63  ;;  %v1540_v15 = vsub.f32 %v1529_v11, %v1377_v62 }
 0x2a4   : > { %2598 = vmatprep.subr.mxu1 %v1549_v12  ;;  %v1548_v27 = vmul.f32 %v1546_v9, %v3034_v14 }
 0x2a5   : > { %v1553_v29 = vsub.f32 %v1543_v13, %v2378_v10  ;;  %v1542_v30 = vsub.f32 %v1540_v15, %v1452_v2  ;;  %2599 = vmatpush3.msra.mxu1 %v1549_v12 }
 0x2a6   : > { %2600 = vmatprep.subr.mxu1 %v1548_v27 }
 0x2a7   : > { %v1552_v31 = vsub.f32 %v1542_v30, %v2377_v22  ;;  %2601 = vmatpush3.msra.mxu1 %v1548_v27  ;;  %v1555_v33 = vmul.f32 %v1553_v29, %v3031_v8  ;;  %v473_v8 = vmul.f32 %v2899_v18, %v471_v45  ;;  %v1794_v18 = vld [vmem:[%s3080_s14 + $0x8] sm:$0xff] }
 0x2a8   : > { %2603 = vmatmul.mubr.msk.f32.vlgmr.msra.gmra.mxu1 %vm483_vm0, %v2994_v50  ;;  %v468_v50 = vmul.f32 %v467_v39, %v2893_v17  ;;  %v2387_v17 = vld [vmem:[%s3080_s14 + $0x20] sm:$0xff] }
 0x2a9   : > { %2605 = vmatprep.subr.mxu0 %v1555_v33  ;;  %v1554_v41 = vmul.f32 %v1552_v31, %v3034_v14  ;;  %v1707_v42 = vadd.f32 %v1555_v33, %v1549_v12  ;;  %2616 = vmatprep.mubr.msk.f32.mxu1 %vm483_vm0, %v3048_v44  ;;  %v472_v14 = vmul.f32 %v2910_v19, %v471_v45 }
 0x2aa   : > { %2606 = vmatpush3.msra.mxu0 %v1555_v33  ;;  %v2000_v19 = vadd.f32 %v473_v8, %v469_v43  ;;  %v1995_v63 = vadd.f32 %v2387_v17, %v1793_v16 }
 0x2ab   : > { %2607 = vmatprep.subr.mxu0 %v1554_v41  ;;  %2612 = vmatprep.subr.mxu1 %v1707_v42  ;;  %v1706_v47 = vadd.f32 %v1554_v41, %v1548_v27  ;;  %v1999_v44 = vadd.f32 %v472_v14, %v468_v50 }
 0x2ac   : > { %2608 = vmatpush3.msra.mxu0 %v1554_v41  ;;  %2613 = vmatpush3.msra.mxu1 %v1707_v42 }
 0x2ad   : > { %2610 = vmatmul.mubr.msk.f32.vlgmr.msra.gmra.mxu0 %vm483_vm0, %v3040_v37  ;;  %2614 = vmatprep.subr.mxu1 %v1706_v47  ;;  %v2388_v37 = vld [vmem:[%s3080_s14 + $0x28] sm:$0xff] }
 0x2ae   : > { %2619 = vmatprep.subr.mxu0 %v469_v43  ;;  %2615 = vmatpush3.msra.mxu1 %v1706_v47  ;;  %v1996_v2 = vadd.f32 %v2388_v37, %v1794_v18 }
 0x2af   : > { %2620 = vmatpush3.msra.mxu0 %v469_v43  ;;  %2623 = vmatprep.mubr.msk.f32.mxu0 %vm483_vm0, %v1793_v16 }
 0x2b0   : > { %2617 = vmatmul.mubr.msk.f32.vlgmr.msra.gmra.mxu1 %vm483_vm0, %v3053_v46  ;;  %2621 = vmatprep.subr.mxu0 %v468_v50 }
 0x2b1   : > { %2629 = vmatprep.subr.mxu1 %v473_v8  ;;  %2622 = vmatpush3.msra.mxu0 %v468_v50 }
 0x2b2   : > { %2630 = vmatpush3.msra.mxu1 %v473_v8  ;;  %2633 = vmatprep.mubr.msk.f32.mxu1 %vm483_vm0, %v2387_v17 }
 0x2b3   : > { %2624 = vmatmul.mubr.msk.f32.vlgmr.msra.gmra.mxu0 %vm483_vm0, %v1794_v18  ;;  %2631 = vmatprep.subr.mxu1 %v472_v14 }
 0x2b4   : > { %2632 = vmatpush3.msra.mxu1 %v472_v14  ;;  %2639 = vmatprep.subr.mxu0 %v2000_v19 }
 0x2b5   : > { %2634 = vmatmul.mubr.msk.f32.vlgmr.msra.gmra.mxu1 %vm483_vm0, %v2388_v37  ;;  %2640 = vmatpush3.msra.mxu0 %v2000_v19 }
 0x2b6   : > { %2641 = vmatprep.subr.mxu0 %v1999_v44 }
 0x2b7   : > { %2642 = vmatpush3.msra.mxu0 %v1999_v44 }
 0x368   : > { %v2604_v46 = vpop.f32.mrf.mxu1 }
 0x36a   : > { %v1622_v48 = vpop.f32.mrf.mxu1 }
 0x36d   : > { %v2611_v49 = vpop.f32.mrf.mxu0 }
 0x36e   : > { %v1784_v38 = vsub.f32 %v2604_v46, %v2611_v49 }
 0x36f   : > { %v1697_v51 = vpop.f32.mrf.mxu0 }
 0x370   : > { %1790 = vst.msk [vmem:[%s3080_s14 + $0x18] sm:$0xff] %vm483_vm0, %v1784_v38  ;;  %v1783_v40 = vsub.f32 %v1622_v48, %v1697_v51  ;;  %v2618_v35 = vpop.f32.mrf.mxu1 }
 0x371   : > { %v1786_v52 = vsub.f32 %v2618_v35, %v2604_v46 }
 0x372   : > { %1789 = vst.msk [vmem:[%s3080_s14 + $0x10] sm:$0xff] %vm483_vm0, %v1783_v40  ;;  %v1774_v54 = vpop.f32.mrf.mxu1 }
 0x373   : > { %v1788_v57 = vsub.f32 %v1786_v52, %v2611_v49  ;;  %v1785_v53 = vsub.f32 %v1774_v54, %v1622_v48  ;;  %v2625_v34 = vpop.f32.mrf.mxu0 }
 0x375   : > { %2386 = vst.msk [vmem:[%s3080_s14 + $0x38] sm:$0xff] %vm483_vm0, %v1788_v57  ;;  %v1787_v36 = vsub.f32 %v1785_v53, %v1697_v51  ;;  %v2635_v55 = vpop.f32.mrf.mxu1  ;;  %v1879_v58 = vpop.f32.mrf.mxu0 }
 0x376   : > { %v2099_v56 = vsub.f32 %v2625_v34, %v2635_v55 }
 0x377   : > { %2385 = vst.msk [vmem:[%s3080_s14 + $0x30] sm:$0xff] %vm483_vm0, %v1787_v36  ;;  %v1976_v59 = vpop.f32.mrf.mxu1  ;;  %v1796_v1 = vld [vmem:[%s3080_s14 + $0x18] sm:$0xff] }
 0x378   : > { %v2115_v60 = vsub.f32 %v2925_v24, %v2099_v56  ;;  %v2098_v61 = vsub.f32 %v1879_v58, %v1976_v59 }
 0x379   : > { %v1795_v62 = vld [vmem:[%s3080_s14 + $0x10] sm:$0xff] }
 0x37a   : > { %2119 = vst.msk [vmem:[%s3080_s14 + $0x8] sm:$0xff] %vm483_vm0, %v2115_v60  ;;  %v2114_v0 = vsub.f32 %v2915_v20, %v2098_v61  ;;  %2626 = vmatprep.mubr.msk.f32.mxu0 %vm483_vm0, %v1795_v62 }
 0x37b   : > { %2627 = vmatmul.mubr.msk.f32.gmra.mxu0 %vm483_vm0, %v1796_v1 }
 0x37c   : > { %2118 = vst.msk [vmem:[%s3080_s14] sm:$0xff] %vm483_vm0, %v2114_v0  ;;  %2643 = vmatprep.mubr.msk.f32.mxu0 %vm483_vm0, %v1995_v63  ;;  %v2390_v4 = vld [vmem:[%s3080_s14 + $0x38] sm:$0xff] }
 0x37d   : > { %v1998_v20 = vadd.f32 %v2390_v4, %v1796_v1 }
 0x37e   : > { %v2389_v3 = vld [vmem:[%s3080_s14 + $0x30] sm:$0xff] }
 0x37f   : > { %2636 = vmatprep.mubr.msk.f32.mxu1 %vm483_vm0, %v2389_v3  ;;  %v1997_v24 = vadd.f32 %v2389_v3, %v1795_v62  ;;  %2644 = vmatmul.mubr.msk.f32.vlgmr.msra.gmra.mxu0 %vm483_vm0, %v1996_v2 }
 0x380   : > { %2637 = vmatmul.mubr.msk.f32.gmra.mxu1 %vm483_vm0, %v2390_v4 }
 0x381   : > { %2646 = vmatprep.mubr.msk.f32.mxu0 %vm483_vm0, %v1997_v24 }
 0x383   : > { %2647 = vmatmul.mubr.msk.f32.gmra.mxu0 %vm483_vm0, %v1998_v20 }
 0x43b   : > { %v2628_v5 = vpop.f32.mrf.mxu0 }
 0x43d   : > { %v1889_v6 = vpop.f32.mrf.mxu0 }
 0x43f   : > { %v2645_v7 = vpop.f32.mrf.mxu0 }
 0x440   : > { %v2638_v9 = vpop.f32.mrf.mxu1  ;;  %v2103_v10 = vsub.f32 %v2645_v7, %v2625_v34 }
 0x441   : > { %v2101_v11 = vsub.f32 %v2628_v5, %v2638_v9  ;;  %v2079_v12 = vpop.f32.mrf.mxu0 }
 0x442   : > { %v2107_v13 = vsub.f32 %v2103_v10, %v2635_v55  ;;  %v1986_v15 = vpop.f32.mrf.mxu1  ;;  %v2102_v22 = vsub.f32 %v2079_v12, %v1879_v58 }
 0x443   : > { %v2117_v27 = vsub.f32 %v2933_v26, %v2101_v11  ;;  %v2100_v29 = vsub.f32 %v1889_v6, %v1986_v15  ;;  %v2648_v30 = vpop.f32.mrf.mxu0 }
 0x444   : > { %v2127_v31 = vsub.f32 %v2931_v25, %v2107_v13  ;;  %v2106_v33 = vsub.f32 %v2102_v22, %v1976_v59  ;;  %v2105_v39 = vsub.f32 %v2648_v30, %v2628_v5 }
 0x445   : > { %2121 = vst.msk [vmem:[%s3080_s14 + $0x18] sm:$0xff] %vm483_vm0, %v2117_v27  ;;  %v2116_v41 = vsub.f32 %v2917_v21, %v2100_v29  ;;  %v2089_v42 = vpop.f32.mrf.mxu0  ;;  %v2188_v21 = vld [vmem:[%s3080_s14] sm:$0xff] (%p2857_p6) }
 0x446   : > { %2408 = vst.msk [vmem:[%s3080_s14 + $0x28] sm:$0xff] %vm483_vm0, %v2127_v31  ;;  %v2126_v43 = vsub.f32 %v2923_v23, %v2106_v33  ;;  %v2109_v45 = vsub.f32 %v2105_v39, %v2638_v9  ;;  %v2104_v47 = vsub.f32 %v2089_v42, %v1889_v6  ;;  %v2190_v23 = vld [vmem:[%s3080_s14 + $0x8] sm:$0xff] (%p2857_p6)  ;;  %2189 = vst [vmem:[%s2145_s19] sm:$0xff] (%p2857_p6), %v2188_v21 }
 0x447   : > { %2120 = vst.msk [vmem:[%s3080_s14 + $0x10] sm:$0xff] %vm483_vm0, %v2116_v41  ;;  %2191 = vst [vmem:[%s2145_s19 + $0x8] sm:$0xff] (%p2857_p6), %v2190_v23 }
 0x448   : > { %2407 = vst.msk [vmem:[%s3080_s14 + $0x20] sm:$0xff] %vm483_vm0, %v2126_v43  ;;  %v2129_v25 = vsub.f32 %v2952_v32, %v2109_v45  ;;  %v2108_v26 = vsub.f32 %v2104_v47, %v1986_v15  ;;  %2140 = sbr.rel (!%p2857_p6) target bundleno = 1109 (0x455), region = 124 }
 0x44a   : > { %2410 = vst.msk [vmem:[%s3080_s14 + $0x38] sm:$0xff] %vm483_vm0, %v2129_v25  ;;  %v2128_v50 = vsub.f32 %v2937_v28, %v2108_v26 }
 0x44c   : > { %2409 = vst.msk [vmem:[%s3080_s14 + $0x30] sm:$0xff] %vm483_vm0, %v2128_v50  ;;  %v2194_v28 = vld [vmem:[%s3080_s14 + $0x18] sm:$0xff] (%p2857_p6) }
 0x44d   : > { %v2198_v16 = vld [vmem:[%s3080_s14 + $0x28] sm:$0xff]  ;;  %2195 = vst [vmem:[%s2145_s19 + $0x18] sm:$0xff] %v2194_v28 }
 0x44e   : > { %v2192_v32 = vld [vmem:[%s3080_s14 + $0x10] sm:$0xff]  ;;  %2199 = vst [vmem:[%s2145_s19 + $0x88] sm:$0xff] %v2198_v16 }
 0x44f   : > { %v2196_v8 = vld [vmem:[%s3080_s14 + $0x20] sm:$0xff]  ;;  %2193 = vst [vmem:[%s2145_s19 + $0x10] sm:$0xff] %v2192_v32 }
 0x450   : > { %2197 = vst [vmem:[%s2145_s19 + $0x80] sm:$0xff] %v2196_v8 }
 0x451   : > { %v2202_v17 = vld [vmem:[%s3080_s14 + $0x38] sm:$0xff] }
 0x452   : > { %2203 = vst [vmem:[%s2145_s19 + $0x98] sm:$0xff] %v2202_v17 }
 0x453   : > { %v2200_v14 = vld [vmem:[%s3080_s14 + $0x30] sm:$0xff] }
 0x454   : > { %2201 = vst [vmem:[%s2145_s19 + $0x90] sm:$0xff] %v2200_v14 }
 0x455 PF: > { %s17_s29 = sadd.s32 1, %s2763_s29   ;;  %s3211_s23 = smov %s2743_s24 }
 0x456   : > { %p14_p13 = scmp.ge.s32.totalorder %s17_s29, 6   ;;  %s3212_s24 = smov %s2866_s16 }
 0x457   : > { %s3213_s25 = smov %s2755_s27  ;;  %s3214_s26 = smov %s2759_s28 }
 0x458   : > { %s3215_s27 = smov %s3218_s0  ;;  %s3216_s28 = smov %s3222_s30 }
 0x459   :  { %16 = sbr.rel (!%p14_p13) target bundleno = 6 (0x6), region = 209 }

</bundles_post_ra>
